<compile_context>
chip_gen: v6e
topology: v6e:2x2x1
jax: 0.10.0
libtpu: 0.0.40
codegen_flags: <defaults>
</compile_context>

<pallas_src>
import jax
import jax.numpy as jnp
from jax import lax
from jax.experimental import pallas as pl
from jax.experimental.pallas import tpu as pltpu

# ---- synthetic model hyperparameters -------------------------------------
V = 128        # vocab size
D = 32         # hidden size
H = 2          # attention heads
HD = D // H    # head dim
FF = 4 * D     # MLP hidden
L = 2          # transformer layers
MAXPOS = 64    # max positions
PREFIX_LEN = 4
LN_EPS = 1e-5
SUBLANE = 8


def _layernorm(x, g, b):
    mu = jnp.mean(x, axis=-1, keepdims=True)
    var = jnp.mean((x - mu) ** 2, axis=-1, keepdims=True)
    return (x - mu) * lax.rsqrt(var + LN_EPS) * g + b


# ---- fused forward kernel --------------------------------------------------
def _make_kernel(B, S):
    BS = B * S
    scale = 1.0 / (HD ** 0.5)

    def kernel(toks_ref, wte_ref, wpe_ref,
               wqkv_ref, wo_ref, w1_ref, w2_ref,
               ln1g_ref, ln1b_ref, ln2g_ref, ln2b_ref,
               lnfg_ref, lnfb_ref, wv_ref,
               hid_ref, logit_ref, attn_buf):
        # --- token embedding: gather-free one-hot matmul (MXU) ---
        toks = toks_ref[...]                                     # (BS, 1) i32
        vocab_iota = lax.broadcasted_iota(jnp.int32, (BS, V), 1)
        onehot = (vocab_iota == toks).astype(jnp.bfloat16)       # exact 0/1
        h = jnp.dot(onehot, wte_ref[...],
                    preferred_element_type=jnp.float32)          # (BS, D) f32

        # --- positional embedding: broadcast over batch (no sublane concat) ---
        pos = wpe_ref[0:S, :]                                    # (S, D) f32
        h = h + jnp.broadcast_to(pos[None, :, :], (B, S, D)).reshape(BS, D)

        # --- causal additive bias, hoisted out of the layer loop ---
        row = lax.broadcasted_iota(jnp.int32, (S, S), 0)
        col = lax.broadcasted_iota(jnp.int32, (S, S), 1)
        causal_bias = jnp.where(col <= row, 0.0, -1e30).astype(jnp.float32)

        # --- transformer layers (static unroll; weights stay in VMEM) ---
        for l in range(L):
            wqkv = wqkv_ref[l]                                   # (D, 3D) bf16
            wo = wo_ref[l]                                       # (D, D)  bf16
            w1 = w1_ref[l]                                       # (D, FF) bf16
            w2 = w2_ref[l]                                       # (FF, D) bf16

            # ---- attention ----
            ln1 = _layernorm(h, ln1g_ref[l], ln1b_ref[l])        # (BS, D) f32
            qkv = jnp.dot(ln1.astype(jnp.bfloat16), wqkv,
                          preferred_element_type=jnp.float32)    # (BS, 3D) f32
            for b in range(B):                                   # static, tiny
                r0 = b * S                                       # multiple of 8
                for hh in range(H):                              # static, tiny
                    c0 = hh * HD
                    qh = qkv[r0:r0 + S, c0:c0 + HD]
                    kh = qkv[r0:r0 + S, D + c0:D + c0 + HD]
                    vh = qkv[r0:r0 + S, 2 * D + c0:2 * D + c0 + HD]
                    # q @ k^T without an explicit transpose
                    s = lax.dot_general(
                        qh, kh, (((1,), (1,)), ((), ())),
                        preferred_element_type=jnp.float32) * scale
                    s = s + causal_bias
                    p = jnp.exp(s - jnp.max(s, axis=-1, keepdims=True))
                    l_sum = jnp.sum(p, axis=-1, keepdims=True)   # (S, 1)
                    pv = jnp.dot(p, vh,
                                 preferred_element_type=jnp.float32)  # (S, HD)
                    # fold 1/l into the small (S, HD) result; EUP approx recip
                    pv = pv * pl.reciprocal(l_sum, approx=True)
                    # this head's 16-lane slot of the attention output slab
                    # (both head chunks live in one 128-lane vreg).
                    attn_buf[r0:r0 + S, c0:c0 + HD] = pv
            # ONE consolidated output projection per layer.
            h = h + jnp.dot(attn_buf[...].astype(jnp.bfloat16), wo,
                            preferred_element_type=jnp.float32)

            # ---- MLP (GPT-2 "gelu_new" = tanh approximation) ----
            ln2 = _layernorm(h, ln2g_ref[l], ln2b_ref[l])
            ff = jax.nn.gelu(
                jnp.dot(ln2.astype(jnp.bfloat16), w1,
                        preferred_element_type=jnp.float32),
                approximate=True)
            h = h + jnp.dot(ff.astype(jnp.bfloat16), w2,
                            preferred_element_type=jnp.float32)

        # --- final LN -> hidden_states[-1]; lm-head over the whole slab ---
        hn = _layernorm(h, lnfg_ref[...], lnfb_ref[...])         # (BS, D) f32
        hid_ref[...] = hn
        # Lane-dense (BS, 128) logits store; the last real position is sliced
        # in the wrapper (no per-row sublane gathers / concats here).
        logit_ref[...] = jnp.dot(hn.astype(jnp.bfloat16), wv_ref[...],
                                 preferred_element_type=jnp.float32)

    return kernel


def _cost_estimate(B, S):
    BS = B * S
    flops = 2 * BS * V * D                                  # embedding
    flops += L * (2 * BS * D * 3 * D                        # qkv
                  + 2 * B * H * 2 * S * S * HD              # scores + p@v
                  + 2 * BS * D * D                          # wo
                  + 2 * 2 * BS * D * FF)                    # mlp
    flops += 2 * BS * D * V                                 # lm head
    transcendentals = L * (B * H * S * S + BS * FF) + 3 * BS
    bytes_accessed = (
        4 * BS
        + 2 * (V * D + L * (3 * D * D + D * D + 2 * D * FF) + D * V)
        + 4 * (MAXPOS * D + L * 4 * D + 2 * D)
        + 4 * (BS * D + BS * V))
    return pl.CostEstimate(flops=flops, transcendentals=transcendentals,
                           bytes_accessed=bytes_accessed)


def fused_forward(toks_flat, params, B, S):
    """Single pallas_call: embeddings -> layers -> final LN -> lm head."""
    BS = B * S
    vmem = pl.BlockSpec(memory_space=pltpu.MemorySpace.VMEM)
    return pl.pallas_call(
        _make_kernel(B, S),
        out_shape=(jax.ShapeDtypeStruct((BS, D), jnp.float32),   # hidden slab
                   jax.ShapeDtypeStruct((BS, V), jnp.float32)),  # logits slab
        in_specs=[vmem] * 14,
        out_specs=(vmem, vmem),
        scratch_shapes=[pltpu.VMEM((BS, D), jnp.float32)],       # attn output
        cost_estimate=_cost_estimate(B, S),
    )(toks_flat,
      params["wte"], params["wpe"],
      params["wqkv"], params["wo"], params["w1"], params["w2"],
      params["ln1g"], params["ln1b"], params["ln2g"], params["ln2b"],
      params["lnf_g"], params["lnf_b"], params["wv"])


# ---- parameters (deterministic, synthetic; layer weights stacked on L) -----
def init_params(key):
    keys = iter(jax.random.split(key, 8))

    def w(shape, dtype=jnp.bfloat16):   # matmul weights in bf16 (MXU-native)
        return (0.02 * jax.random.normal(next(keys), shape)).astype(dtype)

    return {
        "prefix": jnp.array([3, 5, 7, 11], dtype=jnp.int32),  # synthetic tok_q(prefix)
        "wte": w((V, D)),
        "wpe": w((MAXPOS, D), jnp.float32),      # used in f32 elementwise add
        "wqkv": w((L, D, 3 * D)),
        "wo": w((L, D, D)),
        "w1": w((L, D, FF)),
        "w2": w((L, FF, D)),
        "ln1g": jnp.ones((L, 1, D), jnp.float32),
        "ln1b": jnp.zeros((L, 1, D), jnp.float32),
        "ln2g": jnp.ones((L, 1, D), jnp.float32),
        "ln2b": jnp.zeros((L, 1, D), jnp.float32),
        "lnf_g": jnp.ones((1, D), jnp.float32),
        "lnf_b": jnp.zeros((1, D), jnp.float32),
        "wv": w((D, V)),
    }


# ---- Proposal.forward ------------------------------------------------------
def proposal_forward(tokens, params):
    """tokens: (B, T) int32.  Returns (logits[:, -1], hidden_states[-1])."""
    B, T = tokens.shape
    prefix = params["prefix"]
    P = prefix.shape[0]
    S_real = T + P
    if S_real > MAXPOS:
        raise ValueError(f"sequence length {S_real} exceeds MAXPOS={MAXPOS}")
    # Pad the sequence to a multiple of 8 sublanes so every per-batch slice
    # and store inside the kernel is (8, 128)-tile aligned.  Pad tokens sit
    # past every real token, so the causal mask keeps them from influencing
    # real positions; their rows are sliced off below.
    S_pad = ((S_real + SUBLANE - 1) // SUBLANE) * SUBLANE
    pieces = [jnp.broadcast_to(prefix[None, :], (B, P)).astype(jnp.int32),
              tokens.astype(jnp.int32)]
    if S_pad > S_real:
        pieces.append(jnp.zeros((B, S_pad - S_real), jnp.int32))
    toks = jnp.concatenate(pieces, axis=1)                        # (B, S_pad)
    # attention_mask = ones_like(toks): every real position is valid, so the
    # only masking needed is the causal mask applied inside the fused kernel.
    toks_flat = toks.reshape(B * S_pad, 1)
    hid_flat, logits_flat = fused_forward(toks_flat, params, B, S_pad)
    hidden_last = hid_flat.reshape(B, S_pad, D)[:, :S_real, :]    # post final-LN
    logits_last = logits_flat.reshape(B, S_pad, V)[:, S_real - 1, :]
    # TODO(synk): the original wraps a HuggingFace model with use_cache=True;
    # incremental-decoding KV cache is not modeled here.
    return logits_last, hidden_last


if __name__ == "__main__":
    key = jax.random.PRNGKey(0)
    kp, kt = jax.random.split(key)
    params = init_params(kp)

    B, T = 2, 8
    tokens = jax.random.randint(kt, (B, T), 0, V, dtype=jnp.int32)

    logits_last, hidden = jax.jit(proposal_forward)(tokens, params)
    jax.block_until_ready((logits_last, hidden))

    assert logits_last.shape == (B, V)
    assert hidden.shape == (B, T + PREFIX_LEN, D)
    assert logits_last.dtype == jnp.float32 and hidden.dtype == jnp.float32
    assert bool(jnp.all(jnp.isfinite(logits_last)))
    assert bool(jnp.all(jnp.isfinite(hidden)))
    print("KERNEL_OK")
</pallas_src>

<mosaic_0001>
module attributes {stable_mosaic.version = 11 : i64} {
  func.func @kernel(%arg0: memref<32x1xi32, #tpu.memory_space<vmem>>, %arg1: memref<128x32xbf16, #tpu.memory_space<vmem>>, %arg2: memref<64x32xf32, #tpu.memory_space<vmem>>, %arg3: memref<2x32x96xbf16, #tpu.memory_space<vmem>>, %arg4: memref<2x32x32xbf16, #tpu.memory_space<vmem>>, %arg5: memref<2x32x128xbf16, #tpu.memory_space<vmem>>, %arg6: memref<2x128x32xbf16, #tpu.memory_space<vmem>>, %arg7: memref<2x1x32xf32, #tpu.memory_space<vmem>>, %arg8: memref<2x1x32xf32, #tpu.memory_space<vmem>>, %arg9: memref<2x1x32xf32, #tpu.memory_space<vmem>>, %arg10: memref<2x1x32xf32, #tpu.memory_space<vmem>>, %arg11: memref<1x32xf32, #tpu.memory_space<vmem>>, %arg12: memref<1x32xf32, #tpu.memory_space<vmem>>, %arg13: memref<32x128xbf16, #tpu.memory_space<vmem>>, %arg14: memref<32x32xf32, #tpu.memory_space<vmem>>, %arg15: memref<32x128xf32, #tpu.memory_space<vmem>>, %arg16: memref<32x32xf32, #tpu.memory_space<vmem>>) attributes {dimension_semantics = [], scalar_prefetch = 0 : i64, scratch_operands = 1 : i64, tpu.core_type = #tpu.core_type<tc>} {
    %c0 = arith.constant 0 : index
    %c0_0 = arith.constant 0 : index
    %0 = vector.load %arg0[%c0, %c0_0] : memref<32x1xi32, #tpu.memory_space<vmem>>, vector<32x1xi32>
    %1 = tpu.iota {dimensions = array<i32: 1>} : vector<32x128xi32>
    %2 = vector.broadcast %0 : vector<32x1xi32> to vector<32x128xi32>
    %3 = arith.cmpi eq, %1, %2 : vector<32x128xi32>
    %4 = arith.extui %3 : vector<32x128xi1> to vector<32x128xi32>
    %5 = arith.sitofp %4 : vector<32x128xi32> to vector<32x128xf32>
    %6 = arith.truncf %5 : vector<32x128xf32> to vector<32x128xbf16>
    %c0_1 = arith.constant 0 : index
    %c0_2 = arith.constant 0 : index
    %7 = vector.load %arg1[%c0_1, %c0_2] : memref<128x32xbf16, #tpu.memory_space<vmem>>, vector<128x32xbf16>
    %cst = arith.constant dense<0.000000e+00> : vector<32x32xf32>
    %8 = tpu.matmul %6, %7, %cst {dimension_numbers = #tpu.dot_dimension_numbers<[1], [0], [0], [1], [0, 0, 1, 1], [], []>} : vector<32x128xbf16>, vector<128x32xbf16>, vector<32x32xf32> -> vector<32x32xf32>
    %c0_3 = arith.constant 0 : index
    %c0_4 = arith.constant 0 : index
    %9 = vector.load %arg2[%c0_3, %c0_4] : memref<64x32xf32, #tpu.memory_space<vmem>>, vector<16x32xf32>
    %10 = vector.shape_cast %9 : vector<16x32xf32> to vector<1x16x32xf32>
    %11 = vector.shape_cast %10 : vector<1x16x32xf32> to vector<1x16x32xf32>
    %12 = vector.broadcast %11 : vector<1x16x32xf32> to vector<2x16x32xf32>
    %13 = vector.shape_cast %12 : vector<2x16x32xf32> to vector<32x32xf32>
    %14 = arith.addf %8, %13 : vector<32x32xf32>
    %15 = tpu.iota {dimensions = array<i32: 0>} : vector<16x16xi32>
    %16 = tpu.iota {dimensions = array<i32: 1>} : vector<16x16xi32>
    %17 = arith.cmpi sle, %16, %15 : vector<16x16xi32>
    %cst_5 = arith.constant 0.000000e+00 : f32
    %cst_6 = arith.constant -1.000000e+30 : f32
    %18 = vector.broadcast %cst_5 : f32 to vector<16x16xf32>
    %19 = vector.broadcast %cst_6 : f32 to vector<16x16xf32>
    %20 = arith.select %17, %18, %19 : vector<16x16xi1>, vector<16x16xf32>
    %c0_7 = arith.constant 0 : index
    %c0_8 = arith.constant 0 : index
    %c0_9 = arith.constant 0 : index
    %21 = vector.load %arg3[%c0_7, %c0_8, %c0_9] : memref<2x32x96xbf16, #tpu.memory_space<vmem>>, vector<1x32x96xbf16>
    %22 = vector.shape_cast %21 : vector<1x32x96xbf16> to vector<32x96xbf16>
    %c0_10 = arith.constant 0 : index
    %c0_11 = arith.constant 0 : index
    %c0_12 = arith.constant 0 : index
    %23 = vector.load %arg4[%c0_10, %c0_11, %c0_12] : memref<2x32x32xbf16, #tpu.memory_space<vmem>>, vector<1x32x32xbf16>
    %24 = vector.shape_cast %23 : vector<1x32x32xbf16> to vector<32x32xbf16>
    %c0_13 = arith.constant 0 : index
    %c0_14 = arith.constant 0 : index
    %c0_15 = arith.constant 0 : index
    %25 = vector.load %arg5[%c0_13, %c0_14, %c0_15] : memref<2x32x128xbf16, #tpu.memory_space<vmem>>, vector<1x32x128xbf16>
    %26 = vector.shape_cast %25 : vector<1x32x128xbf16> to vector<32x128xbf16>
    %c0_16 = arith.constant 0 : index
    %c0_17 = arith.constant 0 : index
    %c0_18 = arith.constant 0 : index
    %27 = vector.load %arg6[%c0_16, %c0_17, %c0_18] : memref<2x128x32xbf16, #tpu.memory_space<vmem>>, vector<1x128x32xbf16>
    %28 = vector.shape_cast %27 : vector<1x128x32xbf16> to vector<128x32xbf16>
    %c0_19 = arith.constant 0 : index
    %c0_20 = arith.constant 0 : index
    %c0_21 = arith.constant 0 : index
    %29 = vector.load %arg7[%c0_19, %c0_20, %c0_21] : memref<2x1x32xf32, #tpu.memory_space<vmem>>, vector<1x1x32xf32>
    %30 = vector.shape_cast %29 : vector<1x1x32xf32> to vector<1x32xf32>
    %c0_22 = arith.constant 0 : index
    %c0_23 = arith.constant 0 : index
    %c0_24 = arith.constant 0 : index
    %31 = vector.load %arg8[%c0_22, %c0_23, %c0_24] : memref<2x1x32xf32, #tpu.memory_space<vmem>>, vector<1x1x32xf32>
    %32 = vector.shape_cast %31 : vector<1x1x32xf32> to vector<1x32xf32>
    %cst_25 = arith.constant dense<0.000000e+00> : vector<32xf32>
    %33 = vector.multi_reduction <add>, %14, %cst_25 [1] : vector<32x32xf32> to vector<32xf32>
    %34 = vector.shape_cast %33 : vector<32xf32> to vector<32x1xf32>
    %cst_26 = arith.constant 3.200000e+01 : f32
    %35 = vector.broadcast %cst_26 : f32 to vector<32x1xf32>
    %36 = arith.divf %34, %35 : vector<32x1xf32>
    %37 = vector.broadcast %36 : vector<32x1xf32> to vector<32x32xf32>
    %38 = arith.subf %14, %37 : vector<32x32xf32>
    %39 = arith.mulf %38, %38 : vector<32x32xf32>
    %cst_27 = arith.constant dense<0.000000e+00> : vector<32xf32>
    %40 = vector.multi_reduction <add>, %39, %cst_27 [1] : vector<32x32xf32> to vector<32xf32>
    %41 = vector.shape_cast %40 : vector<32xf32> to vector<32x1xf32>
    %cst_28 = arith.constant 3.200000e+01 : f32
    %42 = vector.broadcast %cst_28 : f32 to vector<32x1xf32>
    %43 = arith.divf %41, %42 : vector<32x1xf32>
    %44 = vector.broadcast %36 : vector<32x1xf32> to vector<32x32xf32>
    %45 = arith.subf %14, %44 : vector<32x32xf32>
    %cst_29 = arith.constant 9.99999974E-6 : f32
    %46 = vector.broadcast %cst_29 : f32 to vector<32x1xf32>
    %47 = arith.addf %43, %46 : vector<32x1xf32>
    %48 = math.rsqrt %47 : vector<32x1xf32>
    %49 = vector.broadcast %48 : vector<32x1xf32> to vector<32x32xf32>
    %50 = arith.mulf %45, %49 : vector<32x32xf32>
    %51 = vector.broadcast %30 : vector<1x32xf32> to vector<32x32xf32>
    %52 = arith.mulf %50, %51 : vector<32x32xf32>
    %53 = vector.broadcast %32 : vector<1x32xf32> to vector<32x32xf32>
    %54 = arith.addf %52, %53 : vector<32x32xf32>
    %55 = arith.truncf %54 : vector<32x32xf32> to vector<32x32xbf16>
    %cst_30 = arith.constant dense<0.000000e+00> : vector<32x96xf32>
    %56 = tpu.matmul %55, %22, %cst_30 {dimension_numbers = #tpu.dot_dimension_numbers<[1], [0], [0], [1], [0, 0, 1, 1], [], []>} : vector<32x32xbf16>, vector<32x96xbf16>, vector<32x96xf32> -> vector<32x96xf32>
    %57 = vector.extract_strided_slice %56 {offsets = [0, 0], sizes = [16, 16], strides = [1, 1]} : vector<32x96xf32> to vector<16x16xf32>
    %58 = vector.extract_strided_slice %56 {offsets = [0, 32], sizes = [16, 16], strides = [1, 1]} : vector<32x96xf32> to vector<16x16xf32>
    %59 = vector.extract_strided_slice %56 {offsets = [0, 64], sizes = [16, 16], strides = [1, 1]} : vector<32x96xf32> to vector<16x16xf32>
    %cst_31 = arith.constant dense<0.000000e+00> : vector<16x16xf32>
    %60 = tpu.matmul %57, %58, %cst_31 {dimension_numbers = #tpu.dot_dimension_numbers<[1], [1], [0], [0], [0, 0, 1, 0], [], []>} : vector<16x16xf32>, vector<16x16xf32>, vector<16x16xf32> -> vector<16x16xf32>
    %cst_32 = arith.constant 2.500000e-01 : f32
    %61 = vector.broadcast %cst_32 : f32 to vector<16x16xf32>
    %62 = arith.mulf %60, %61 : vector<16x16xf32>
    %63 = arith.addf %62, %20 : vector<16x16xf32>
    %cst_33 = arith.constant dense<0xFF800000> : vector<16xf32>
    %64 = vector.multi_reduction <maximumf>, %63, %cst_33 [1] : vector<16x16xf32> to vector<16xf32>
    %65 = vector.shape_cast %64 : vector<16xf32> to vector<16x1xf32>
    %66 = vector.broadcast %65 : vector<16x1xf32> to vector<16x16xf32>
    %67 = arith.subf %63, %66 : vector<16x16xf32>
    %68 = math.exp %67 : vector<16x16xf32>
    %cst_34 = arith.constant dense<0.000000e+00> : vector<16xf32>
    %69 = vector.multi_reduction <add>, %68, %cst_34 [1] : vector<16x16xf32> to vector<16xf32>
    %70 = vector.shape_cast %69 : vector<16xf32> to vector<16x1xf32>
    %cst_35 = arith.constant dense<0.000000e+00> : vector<16x16xf32>
    %71 = tpu.matmul %68, %59, %cst_35 {dimension_numbers = #tpu.dot_dimension_numbers<[1], [0], [0], [1], [0, 0, 1, 1], [], []>} : vector<16x16xf32>, vector<16x16xf32>, vector<16x16xf32> -> vector<16x16xf32>
    %72 = tpu.reciprocal %70 {approx = true} : vector<16x1xf32> -> vector<16x1xf32>
    %73 = vector.broadcast %72 : vector<16x1xf32> to vector<16x16xf32>
    %74 = arith.mulf %71, %73 : vector<16x16xf32>
    %c0_36 = arith.constant 0 : index
    %c0_37 = arith.constant 0 : index
    %75 = vector.load %arg16[%c0_36, %c0_37] : memref<32x32xf32, #tpu.memory_space<vmem>>, vector<16x16xf32>
    tpu.vector_store %arg16[%c0_36, %c0_37], %74 {strides = array<i32>} : memref<32x32xf32, #tpu.memory_space<vmem>>, vector<16x16xf32>,
    %76 = vector.extract_strided_slice %56 {offsets = [0, 16], sizes = [16, 16], strides = [1, 1]} : vector<32x96xf32> to vector<16x16xf32>
    %77 = vector.extract_strided_slice %56 {offsets = [0, 48], sizes = [16, 16], strides = [1, 1]} : vector<32x96xf32> to vector<16x16xf32>
    %78 = vector.extract_strided_slice %56 {offsets = [0, 80], sizes = [16, 16], strides = [1, 1]} : vector<32x96xf32> to vector<16x16xf32>
    %cst_38 = arith.constant dense<0.000000e+00> : vector<16x16xf32>
    %79 = tpu.matmul %76, %77, %cst_38 {dimension_numbers = #tpu.dot_dimension_numbers<[1], [1], [0], [0], [0, 0, 1, 0], [], []>} : vector<16x16xf32>, vector<16x16xf32>, vector<16x16xf32> -> vector<16x16xf32>
    %cst_39 = arith.constant 2.500000e-01 : f32
    %80 = vector.broadcast %cst_39 : f32 to vector<16x16xf32>
    %81 = arith.mulf %79, %80 : vector<16x16xf32>
    %82 = arith.addf %81, %20 : vector<16x16xf32>
    %cst_40 = arith.constant dense<0xFF800000> : vector<16xf32>
    %83 = vector.multi_reduction <maximumf>, %82, %cst_40 [1] : vector<16x16xf32> to vector<16xf32>
    %84 = vector.shape_cast %83 : vector<16xf32> to vector<16x1xf32>
    %85 = vector.broadcast %84 : vector<16x1xf32> to vector<16x16xf32>
    %86 = arith.subf %82, %85 : vector<16x16xf32>
    %87 = math.exp %86 : vector<16x16xf32>
    %cst_41 = arith.constant dense<0.000000e+00> : vector<16xf32>
    %88 = vector.multi_reduction <add>, %87, %cst_41 [1] : vector<16x16xf32> to vector<16xf32>
    %89 = vector.shape_cast %88 : vector<16xf32> to vector<16x1xf32>
    %cst_42 = arith.constant dense<0.000000e+00> : vector<16x16xf32>
    %90 = tpu.matmul %87, %78, %cst_42 {dimension_numbers = #tpu.dot_dimension_numbers<[1], [0], [0], [1], [0, 0, 1, 1], [], []>} : vector<16x16xf32>, vector<16x16xf32>, vector<16x16xf32> -> vector<16x16xf32>
    %91 = tpu.reciprocal %89 {approx = true} : vector<16x1xf32> -> vector<16x1xf32>
    %92 = vector.broadcast %91 : vector<16x1xf32> to vector<16x16xf32>
    %93 = arith.mulf %90, %92 : vector<16x16xf32>
    %c0_43 = arith.constant 0 : index
    %c16 = arith.constant 16 : index
    %94 = vector.load %arg16[%c0_43, %c16] : memref<32x32xf32, #tpu.memory_space<vmem>>, vector<16x16xf32>
    tpu.vector_store %arg16[%c0_43, %c16], %93 {strides = array<i32>} : memref<32x32xf32, #tpu.memory_space<vmem>>, vector<16x16xf32>,
    %95 = vector.extract_strided_slice %56 {offsets = [16, 0], sizes = [16, 16], strides = [1, 1]} : vector<32x96xf32> to vector<16x16xf32>
    %96 = vector.extract_strided_slice %56 {offsets = [16, 32], sizes = [16, 16], strides = [1, 1]} : vector<32x96xf32> to vector<16x16xf32>
    %97 = vector.extract_strided_slice %56 {offsets = [16, 64], sizes = [16, 16], strides = [1, 1]} : vector<32x96xf32> to vector<16x16xf32>
    %cst_44 = arith.constant dense<0.000000e+00> : vector<16x16xf32>
    %98 = tpu.matmul %95, %96, %cst_44 {dimension_numbers = #tpu.dot_dimension_numbers<[1], [1], [0], [0], [0, 0, 1, 0], [], []>} : vector<16x16xf32>, vector<16x16xf32>, vector<16x16xf32> -> vector<16x16xf32>
    %cst_45 = arith.constant 2.500000e-01 : f32
    %99 = vector.broadcast %cst_45 : f32 to vector<16x16xf32>
    %100 = arith.mulf %98, %99 : vector<16x16xf32>
    %101 = arith.addf %100, %20 : vector<16x16xf32>
    %cst_46 = arith.constant dense<0xFF800000> : vector<16xf32>
    %102 = vector.multi_reduction <maximumf>, %101, %cst_46 [1] : vector<16x16xf32> to vector<16xf32>
    %103 = vector.shape_cast %102 : vector<16xf32> to vector<16x1xf32>
    %104 = vector.broadcast %103 : vector<16x1xf32> to vector<16x16xf32>
    %105 = arith.subf %101, %104 : vector<16x16xf32>
    %106 = math.exp %105 : vector<16x16xf32>
    %cst_47 = arith.constant dense<0.000000e+00> : vector<16xf32>
    %107 = vector.multi_reduction <add>, %106, %cst_47 [1] : vector<16x16xf32> to vector<16xf32>
    %108 = vector.shape_cast %107 : vector<16xf32> to vector<16x1xf32>
    %cst_48 = arith.constant dense<0.000000e+00> : vector<16x16xf32>
    %109 = tpu.matmul %106, %97, %cst_48 {dimension_numbers = #tpu.dot_dimension_numbers<[1], [0], [0], [1], [0, 0, 1, 1], [], []>} : vector<16x16xf32>, vector<16x16xf32>, vector<16x16xf32> -> vector<16x16xf32>
    %110 = tpu.reciprocal %108 {approx = true} : vector<16x1xf32> -> vector<16x1xf32>
    %111 = vector.broadcast %110 : vector<16x1xf32> to vector<16x16xf32>
    %112 = arith.mulf %109, %111 : vector<16x16xf32>
    %c16_49 = arith.constant 16 : index
    %c0_50 = arith.constant 0 : index
    %113 = vector.load %arg16[%c16_49, %c0_50] : memref<32x32xf32, #tpu.memory_space<vmem>>, vector<16x16xf32>
    tpu.vector_store %arg16[%c16_49, %c0_50], %112 {strides = array<i32>} : memref<32x32xf32, #tpu.memory_space<vmem>>, vector<16x16xf32>,
    %114 = vector.extract_strided_slice %56 {offsets = [16, 16], sizes = [16, 16], strides = [1, 1]} : vector<32x96xf32> to vector<16x16xf32>
    %115 = vector.extract_strided_slice %56 {offsets = [16, 48], sizes = [16, 16], strides = [1, 1]} : vector<32x96xf32> to vector<16x16xf32>
    %116 = vector.extract_strided_slice %56 {offsets = [16, 80], sizes = [16, 16], strides = [1, 1]} : vector<32x96xf32> to vector<16x16xf32>
    %cst_51 = arith.constant dense<0.000000e+00> : vector<16x16xf32>
    %117 = tpu.matmul %114, %115, %cst_51 {dimension_numbers = #tpu.dot_dimension_numbers<[1], [1], [0], [0], [0, 0, 1, 0], [], []>} : vector<16x16xf32>, vector<16x16xf32>, vector<16x16xf32> -> vector<16x16xf32>
    %cst_52 = arith.constant 2.500000e-01 : f32
    %118 = vector.broadcast %cst_52 : f32 to vector<16x16xf32>
    %119 = arith.mulf %117, %118 : vector<16x16xf32>
    %120 = arith.addf %119, %20 : vector<16x16xf32>
    %cst_53 = arith.constant dense<0xFF800000> : vector<16xf32>
    %121 = vector.multi_reduction <maximumf>, %120, %cst_53 [1] : vector<16x16xf32> to vector<16xf32>
    %122 = vector.shape_cast %121 : vector<16xf32> to vector<16x1xf32>
    %123 = vector.broadcast %122 : vector<16x1xf32> to vector<16x16xf32>
    %124 = arith.subf %120, %123 : vector<16x16xf32>
    %125 = math.exp %124 : vector<16x16xf32>
    %cst_54 = arith.constant dense<0.000000e+00> : vector<16xf32>
    %126 = vector.multi_reduction <add>, %125, %cst_54 [1] : vector<16x16xf32> to vector<16xf32>
    %127 = vector.shape_cast %126 : vector<16xf32> to vector<16x1xf32>
    %cst_55 = arith.constant dense<0.000000e+00> : vector<16x16xf32>
    %128 = tpu.matmul %125, %116, %cst_55 {dimension_numbers = #tpu.dot_dimension_numbers<[1], [0], [0], [1], [0, 0, 1, 1], [], []>} : vector<16x16xf32>, vector<16x16xf32>, vector<16x16xf32> -> vector<16x16xf32>
    %129 = tpu.reciprocal %127 {approx = true} : vector<16x1xf32> -> vector<16x1xf32>
    %130 = vector.broadcast %129 : vector<16x1xf32> to vector<16x16xf32>
    %131 = arith.mulf %128, %130 : vector<16x16xf32>
    %c16_56 = arith.constant 16 : index
    %c16_57 = arith.constant 16 : index
    %132 = vector.load %arg16[%c16_56, %c16_57] : memref<32x32xf32, #tpu.memory_space<vmem>>, vector<16x16xf32>
    tpu.vector_store %arg16[%c16_56, %c16_57], %131 {strides = array<i32>} : memref<32x32xf32, #tpu.memory_space<vmem>>, vector<16x16xf32>,
    %c0_58 = arith.constant 0 : index
    %c0_59 = arith.constant 0 : index
    %133 = vector.load %arg16[%c0_58, %c0_59] : memref<32x32xf32, #tpu.memory_space<vmem>>, vector<32x32xf32>
    %134 = arith.truncf %133 : vector<32x32xf32> to vector<32x32xbf16>
    %cst_60 = arith.constant dense<0.000000e+00> : vector<32x32xf32>
    %135 = tpu.matmul %134, %24, %cst_60 {dimension_numbers = #tpu.dot_dimension_numbers<[1], [0], [0], [1], [0, 0, 1, 1], [], []>} : vector<32x32xbf16>, vector<32x32xbf16>, vector<32x32xf32> -> vector<32x32xf32>
    %136 = arith.addf %14, %135 : vector<32x32xf32>
    %c0_61 = arith.constant 0 : index
    %c0_62 = arith.constant 0 : index
    %c0_63 = arith.constant 0 : index
    %137 = vector.load %arg9[%c0_61, %c0_62, %c0_63] : memref<2x1x32xf32, #tpu.memory_space<vmem>>, vector<1x1x32xf32>
    %138 = vector.shape_cast %137 : vector<1x1x32xf32> to vector<1x32xf32>
    %c0_64 = arith.constant 0 : index
    %c0_65 = arith.constant 0 : index
    %c0_66 = arith.constant 0 : index
    %139 = vector.load %arg10[%c0_64, %c0_65, %c0_66] : memref<2x1x32xf32, #tpu.memory_space<vmem>>, vector<1x1x32xf32>
    %140 = vector.shape_cast %139 : vector<1x1x32xf32> to vector<1x32xf32>
    %cst_67 = arith.constant dense<0.000000e+00> : vector<32xf32>
    %141 = vector.multi_reduction <add>, %136, %cst_67 [1] : vector<32x32xf32> to vector<32xf32>
    %142 = vector.shape_cast %141 : vector<32xf32> to vector<32x1xf32>
    %cst_68 = arith.constant 3.200000e+01 : f32
    %143 = vector.broadcast %cst_68 : f32 to vector<32x1xf32>
    %144 = arith.divf %142, %143 : vector<32x1xf32>
    %145 = vector.broadcast %144 : vector<32x1xf32> to vector<32x32xf32>
    %146 = arith.subf %136, %145 : vector<32x32xf32>
    %147 = arith.mulf %146, %146 : vector<32x32xf32>
    %cst_69 = arith.constant dense<0.000000e+00> : vector<32xf32>
    %148 = vector.multi_reduction <add>, %147, %cst_69 [1] : vector<32x32xf32> to vector<32xf32>
    %149 = vector.shape_cast %148 : vector<32xf32> to vector<32x1xf32>
    %cst_70 = arith.constant 3.200000e+01 : f32
    %150 = vector.broadcast %cst_70 : f32 to vector<32x1xf32>
    %151 = arith.divf %149, %150 : vector<32x1xf32>
    %152 = vector.broadcast %144 : vector<32x1xf32> to vector<32x32xf32>
    %153 = arith.subf %136, %152 : vector<32x32xf32>
    %cst_71 = arith.constant 9.99999974E-6 : f32
    %154 = vector.broadcast %cst_71 : f32 to vector<32x1xf32>
    %155 = arith.addf %151, %154 : vector<32x1xf32>
    %156 = math.rsqrt %155 : vector<32x1xf32>
    %157 = vector.broadcast %156 : vector<32x1xf32> to vector<32x32xf32>
    %158 = arith.mulf %153, %157 : vector<32x32xf32>
    %159 = vector.broadcast %138 : vector<1x32xf32> to vector<32x32xf32>
    %160 = arith.mulf %158, %159 : vector<32x32xf32>
    %161 = vector.broadcast %140 : vector<1x32xf32> to vector<32x32xf32>
    %162 = arith.addf %160, %161 : vector<32x32xf32>
    %163 = arith.truncf %162 : vector<32x32xf32> to vector<32x32xbf16>
    %cst_72 = arith.constant dense<0.000000e+00> : vector<32x128xf32>
    %164 = tpu.matmul %163, %26, %cst_72 {dimension_numbers = #tpu.dot_dimension_numbers<[1], [0], [0], [1], [0, 0, 1, 1], [], []>} : vector<32x32xbf16>, vector<32x128xbf16>, vector<32x128xf32> -> vector<32x128xf32>
    %165 = arith.mulf %164, %164 : vector<32x128xf32>
    %166 = arith.mulf %164, %165 : vector<32x128xf32>
    %cst_73 = arith.constant 4.471500e-02 : f32
    %167 = vector.broadcast %cst_73 : f32 to vector<32x128xf32>
    %168 = arith.mulf %167, %166 : vector<32x128xf32>
    %169 = arith.addf %164, %168 : vector<32x128xf32>
    %cst_74 = arith.constant 0.797884583 : f32
    %170 = vector.broadcast %cst_74 : f32 to vector<32x128xf32>
    %171 = arith.mulf %170, %169 : vector<32x128xf32>
    %172 = math.tanh %171 : vector<32x128xf32>
    %cst_75 = arith.constant 1.000000e+00 : f32
    %173 = vector.broadcast %cst_75 : f32 to vector<32x128xf32>
    %174 = arith.addf %173, %172 : vector<32x128xf32>
    %cst_76 = arith.constant 5.000000e-01 : f32
    %175 = vector.broadcast %cst_76 : f32 to vector<32x128xf32>
    %176 = arith.mulf %175, %174 : vector<32x128xf32>
    %177 = arith.mulf %164, %176 : vector<32x128xf32>
    %178 = arith.truncf %177 : vector<32x128xf32> to vector<32x128xbf16>
    %cst_77 = arith.constant dense<0.000000e+00> : vector<32x32xf32>
    %179 = tpu.matmul %178, %28, %cst_77 {dimension_numbers = #tpu.dot_dimension_numbers<[1], [0], [0], [1], [0, 0, 1, 1], [], []>} : vector<32x128xbf16>, vector<128x32xbf16>, vector<32x32xf32> -> vector<32x32xf32>
    %180 = arith.addf %136, %179 : vector<32x32xf32>
    %c1 = arith.constant 1 : index
    %c0_78 = arith.constant 0 : index
    %c0_79 = arith.constant 0 : index
    %181 = vector.load %arg3[%c1, %c0_78, %c0_79] : memref<2x32x96xbf16, #tpu.memory_space<vmem>>, vector<1x32x96xbf16>
    %182 = vector.shape_cast %181 : vector<1x32x96xbf16> to vector<32x96xbf16>
    %c1_80 = arith.constant 1 : index
    %c0_81 = arith.constant 0 : index
    %c0_82 = arith.constant 0 : index
    %183 = vector.load %arg4[%c1_80, %c0_81, %c0_82] : memref<2x32x32xbf16, #tpu.memory_space<vmem>>, vector<1x32x32xbf16>
    %184 = vector.shape_cast %183 : vector<1x32x32xbf16> to vector<32x32xbf16>
    %c1_83 = arith.constant 1 : index
    %c0_84 = arith.constant 0 : index
    %c0_85 = arith.constant 0 : index
    %185 = vector.load %arg5[%c1_83, %c0_84, %c0_85] : memref<2x32x128xbf16, #tpu.memory_space<vmem>>, vector<1x32x128xbf16>
    %186 = vector.shape_cast %185 : vector<1x32x128xbf16> to vector<32x128xbf16>
    %c1_86 = arith.constant 1 : index
    %c0_87 = arith.constant 0 : index
    %c0_88 = arith.constant 0 : index
    %187 = vector.load %arg6[%c1_86, %c0_87, %c0_88] : memref<2x128x32xbf16, #tpu.memory_space<vmem>>, vector<1x128x32xbf16>
    %188 = vector.shape_cast %187 : vector<1x128x32xbf16> to vector<128x32xbf16>
    %c1_89 = arith.constant 1 : index
    %c0_90 = arith.constant 0 : index
    %c0_91 = arith.constant 0 : index
    %189 = vector.load %arg7[%c1_89, %c0_90, %c0_91] : memref<2x1x32xf32, #tpu.memory_space<vmem>>, vector<1x1x32xf32>
    %190 = vector.shape_cast %189 : vector<1x1x32xf32> to vector<1x32xf32>
    %c1_92 = arith.constant 1 : index
    %c0_93 = arith.constant 0 : index
    %c0_94 = arith.constant 0 : index
    %191 = vector.load %arg8[%c1_92, %c0_93, %c0_94] : memref<2x1x32xf32, #tpu.memory_space<vmem>>, vector<1x1x32xf32>
    %192 = vector.shape_cast %191 : vector<1x1x32xf32> to vector<1x32xf32>
    %cst_95 = arith.constant dense<0.000000e+00> : vector<32xf32>
    %193 = vector.multi_reduction <add>, %180, %cst_95 [1] : vector<32x32xf32> to vector<32xf32>
    %194 = vector.shape_cast %193 : vector<32xf32> to vector<32x1xf32>
    %cst_96 = arith.constant 3.200000e+01 : f32
    %195 = vector.broadcast %cst_96 : f32 to vector<32x1xf32>
    %196 = arith.divf %194, %195 : vector<32x1xf32>
    %197 = vector.broadcast %196 : vector<32x1xf32> to vector<32x32xf32>
    %198 = arith.subf %180, %197 : vector<32x32xf32>
    %199 = arith.mulf %198, %198 : vector<32x32xf32>
    %cst_97 = arith.constant dense<0.000000e+00> : vector<32xf32>
    %200 = vector.multi_reduction <add>, %199, %cst_97 [1] : vector<32x32xf32> to vector<32xf32>
    %201 = vector.shape_cast %200 : vector<32xf32> to vector<32x1xf32>
    %cst_98 = arith.constant 3.200000e+01 : f32
    %202 = vector.broadcast %cst_98 : f32 to vector<32x1xf32>
    %203 = arith.divf %201, %202 : vector<32x1xf32>
    %204 = vector.broadcast %196 : vector<32x1xf32> to vector<32x32xf32>
    %205 = arith.subf %180, %204 : vector<32x32xf32>
    %cst_99 = arith.constant 9.99999974E-6 : f32
    %206 = vector.broadcast %cst_99 : f32 to vector<32x1xf32>
    %207 = arith.addf %203, %206 : vector<32x1xf32>
    %208 = math.rsqrt %207 : vector<32x1xf32>
    %209 = vector.broadcast %208 : vector<32x1xf32> to vector<32x32xf32>
    %210 = arith.mulf %205, %209 : vector<32x32xf32>
    %211 = vector.broadcast %190 : vector<1x32xf32> to vector<32x32xf32>
    %212 = arith.mulf %210, %211 : vector<32x32xf32>
    %213 = vector.broadcast %192 : vector<1x32xf32> to vector<32x32xf32>
    %214 = arith.addf %212, %213 : vector<32x32xf32>
    %215 = arith.truncf %214 : vector<32x32xf32> to vector<32x32xbf16>
    %cst_100 = arith.constant dense<0.000000e+00> : vector<32x96xf32>
    %216 = tpu.matmul %215, %182, %cst_100 {dimension_numbers = #tpu.dot_dimension_numbers<[1], [0], [0], [1], [0, 0, 1, 1], [], []>} : vector<32x32xbf16>, vector<32x96xbf16>, vector<32x96xf32> -> vector<32x96xf32>
    %217 = vector.extract_strided_slice %216 {offsets = [0, 0], sizes = [16, 16], strides = [1, 1]} : vector<32x96xf32> to vector<16x16xf32>
    %218 = vector.extract_strided_slice %216 {offsets = [0, 32], sizes = [16, 16], strides = [1, 1]} : vector<32x96xf32> to vector<16x16xf32>
    %219 = vector.extract_strided_slice %216 {offsets = [0, 64], sizes = [16, 16], strides = [1, 1]} : vector<32x96xf32> to vector<16x16xf32>
    %cst_101 = arith.constant dense<0.000000e+00> : vector<16x16xf32>
    %220 = tpu.matmul %217, %218, %cst_101 {dimension_numbers = #tpu.dot_dimension_numbers<[1], [1], [0], [0], [0, 0, 1, 0], [], []>} : vector<16x16xf32>, vector<16x16xf32>, vector<16x16xf32> -> vector<16x16xf32>
    %cst_102 = arith.constant 2.500000e-01 : f32
    %221 = vector.broadcast %cst_102 : f32 to vector<16x16xf32>
    %222 = arith.mulf %220, %221 : vector<16x16xf32>
    %223 = arith.addf %222, %20 : vector<16x16xf32>
    %cst_103 = arith.constant dense<0xFF800000> : vector<16xf32>
    %224 = vector.multi_reduction <maximumf>, %223, %cst_103 [1] : vector<16x16xf32> to vector<16xf32>
    %225 = vector.shape_cast %224 : vector<16xf32> to vector<16x1xf32>
    %226 = vector.broadcast %225 : vector<16x1xf32> to vector<16x16xf32>
    %227 = arith.subf %223, %226 : vector<16x16xf32>
    %228 = math.exp %227 : vector<16x16xf32>
    %cst_104 = arith.constant dense<0.000000e+00> : vector<16xf32>
    %229 = vector.multi_reduction <add>, %228, %cst_104 [1] : vector<16x16xf32> to vector<16xf32>
    %230 = vector.shape_cast %229 : vector<16xf32> to vector<16x1xf32>
    %cst_105 = arith.constant dense<0.000000e+00> : vector<16x16xf32>
    %231 = tpu.matmul %228, %219, %cst_105 {dimension_numbers = #tpu.dot_dimension_numbers<[1], [0], [0], [1], [0, 0, 1, 1], [], []>} : vector<16x16xf32>, vector<16x16xf32>, vector<16x16xf32> -> vector<16x16xf32>
    %232 = tpu.reciprocal %230 {approx = true} : vector<16x1xf32> -> vector<16x1xf32>
    %233 = vector.broadcast %232 : vector<16x1xf32> to vector<16x16xf32>
    %234 = arith.mulf %231, %233 : vector<16x16xf32>
    %c0_106 = arith.constant 0 : index
    %c0_107 = arith.constant 0 : index
    %235 = vector.load %arg16[%c0_106, %c0_107] : memref<32x32xf32, #tpu.memory_space<vmem>>, vector<16x16xf32>
    tpu.vector_store %arg16[%c0_106, %c0_107], %234 {strides = array<i32>} : memref<32x32xf32, #tpu.memory_space<vmem>>, vector<16x16xf32>,
    %236 = vector.extract_strided_slice %216 {offsets = [0, 16], sizes = [16, 16], strides = [1, 1]} : vector<32x96xf32> to vector<16x16xf32>
    %237 = vector.extract_strided_slice %216 {offsets = [0, 48], sizes = [16, 16], strides = [1, 1]} : vector<32x96xf32> to vector<16x16xf32>
    %238 = vector.extract_strided_slice %216 {offsets = [0, 80], sizes = [16, 16], strides = [1, 1]} : vector<32x96xf32> to vector<16x16xf32>
    %cst_108 = arith.constant dense<0.000000e+00> : vector<16x16xf32>
    %239 = tpu.matmul %236, %237, %cst_108 {dimension_numbers = #tpu.dot_dimension_numbers<[1], [1], [0], [0], [0, 0, 1, 0], [], []>} : vector<16x16xf32>, vector<16x16xf32>, vector<16x16xf32> -> vector<16x16xf32>
    %cst_109 = arith.constant 2.500000e-01 : f32
    %240 = vector.broadcast %cst_109 : f32 to vector<16x16xf32>
    %241 = arith.mulf %239, %240 : vector<16x16xf32>
    %242 = arith.addf %241, %20 : vector<16x16xf32>
    %cst_110 = arith.constant dense<0xFF800000> : vector<16xf32>
    %243 = vector.multi_reduction <maximumf>, %242, %cst_110 [1] : vector<16x16xf32> to vector<16xf32>
    %244 = vector.shape_cast %243 : vector<16xf32> to vector<16x1xf32>
    %245 = vector.broadcast %244 : vector<16x1xf32> to vector<16x16xf32>
    %246 = arith.subf %242, %245 : vector<16x16xf32>
    %247 = math.exp %246 : vector<16x16xf32>
    %cst_111 = arith.constant dense<0.000000e+00> : vector<16xf32>
    %248 = vector.multi_reduction <add>, %247, %cst_111 [1] : vector<16x16xf32> to vector<16xf32>
    %249 = vector.shape_cast %248 : vector<16xf32> to vector<16x1xf32>
    %cst_112 = arith.constant dense<0.000000e+00> : vector<16x16xf32>
    %250 = tpu.matmul %247, %238, %cst_112 {dimension_numbers = #tpu.dot_dimension_numbers<[1], [0], [0], [1], [0, 0, 1, 1], [], []>} : vector<16x16xf32>, vector<16x16xf32>, vector<16x16xf32> -> vector<16x16xf32>
    %251 = tpu.reciprocal %249 {approx = true} : vector<16x1xf32> -> vector<16x1xf32>
    %252 = vector.broadcast %251 : vector<16x1xf32> to vector<16x16xf32>
    %253 = arith.mulf %250, %252 : vector<16x16xf32>
    %c0_113 = arith.constant 0 : index
    %c16_114 = arith.constant 16 : index
    %254 = vector.load %arg16[%c0_113, %c16_114] : memref<32x32xf32, #tpu.memory_space<vmem>>, vector<16x16xf32>
    tpu.vector_store %arg16[%c0_113, %c16_114], %253 {strides = array<i32>} : memref<32x32xf32, #tpu.memory_space<vmem>>, vector<16x16xf32>,
    %255 = vector.extract_strided_slice %216 {offsets = [16, 0], sizes = [16, 16], strides = [1, 1]} : vector<32x96xf32> to vector<16x16xf32>
    %256 = vector.extract_strided_slice %216 {offsets = [16, 32], sizes = [16, 16], strides = [1, 1]} : vector<32x96xf32> to vector<16x16xf32>
    %257 = vector.extract_strided_slice %216 {offsets = [16, 64], sizes = [16, 16], strides = [1, 1]} : vector<32x96xf32> to vector<16x16xf32>
    %cst_115 = arith.constant dense<0.000000e+00> : vector<16x16xf32>
    %258 = tpu.matmul %255, %256, %cst_115 {dimension_numbers = #tpu.dot_dimension_numbers<[1], [1], [0], [0], [0, 0, 1, 0], [], []>} : vector<16x16xf32>, vector<16x16xf32>, vector<16x16xf32> -> vector<16x16xf32>
    %cst_116 = arith.constant 2.500000e-01 : f32
    %259 = vector.broadcast %cst_116 : f32 to vector<16x16xf32>
    %260 = arith.mulf %258, %259 : vector<16x16xf32>
    %261 = arith.addf %260, %20 : vector<16x16xf32>
    %cst_117 = arith.constant dense<0xFF800000> : vector<16xf32>
    %262 = vector.multi_reduction <maximumf>, %261, %cst_117 [1] : vector<16x16xf32> to vector<16xf32>
    %263 = vector.shape_cast %262 : vector<16xf32> to vector<16x1xf32>
    %264 = vector.broadcast %263 : vector<16x1xf32> to vector<16x16xf32>
    %265 = arith.subf %261, %264 : vector<16x16xf32>
    %266 = math.exp %265 : vector<16x16xf32>
    %cst_118 = arith.constant dense<0.000000e+00> : vector<16xf32>
    %267 = vector.multi_reduction <add>, %266, %cst_118 [1] : vector<16x16xf32> to vector<16xf32>
    %268 = vector.shape_cast %267 : vector<16xf32> to vector<16x1xf32>
    %cst_119 = arith.constant dense<0.000000e+00> : vector<16x16xf32>
    %269 = tpu.matmul %266, %257, %cst_119 {dimension_numbers = #tpu.dot_dimension_numbers<[1], [0], [0], [1], [0, 0, 1, 1], [], []>} : vector<16x16xf32>, vector<16x16xf32>, vector<16x16xf32> -> vector<16x16xf32>
    %270 = tpu.reciprocal %268 {approx = true} : vector<16x1xf32> -> vector<16x1xf32>
    %271 = vector.broadcast %270 : vector<16x1xf32> to vector<16x16xf32>
    %272 = arith.mulf %269, %271 : vector<16x16xf32>
    %c16_120 = arith.constant 16 : index
    %c0_121 = arith.constant 0 : index
    %273 = vector.load %arg16[%c16_120, %c0_121] : memref<32x32xf32, #tpu.memory_space<vmem>>, vector<16x16xf32>
    tpu.vector_store %arg16[%c16_120, %c0_121], %272 {strides = array<i32>} : memref<32x32xf32, #tpu.memory_space<vmem>>, vector<16x16xf32>,
    %274 = vector.extract_strided_slice %216 {offsets = [16, 16], sizes = [16, 16], strides = [1, 1]} : vector<32x96xf32> to vector<16x16xf32>
    %275 = vector.extract_strided_slice %216 {offsets = [16, 48], sizes = [16, 16], strides = [1, 1]} : vector<32x96xf32> to vector<16x16xf32>
    %276 = vector.extract_strided_slice %216 {offsets = [16, 80], sizes = [16, 16], strides = [1, 1]} : vector<32x96xf32> to vector<16x16xf32>
    %cst_122 = arith.constant dense<0.000000e+00> : vector<16x16xf32>
    %277 = tpu.matmul %274, %275, %cst_122 {dimension_numbers = #tpu.dot_dimension_numbers<[1], [1], [0], [0], [0, 0, 1, 0], [], []>} : vector<16x16xf32>, vector<16x16xf32>, vector<16x16xf32> -> vector<16x16xf32>
    %cst_123 = arith.constant 2.500000e-01 : f32
    %278 = vector.broadcast %cst_123 : f32 to vector<16x16xf32>
    %279 = arith.mulf %277, %278 : vector<16x16xf32>
    %280 = arith.addf %279, %20 : vector<16x16xf32>
    %cst_124 = arith.constant dense<0xFF800000> : vector<16xf32>
    %281 = vector.multi_reduction <maximumf>, %280, %cst_124 [1] : vector<16x16xf32> to vector<16xf32>
    %282 = vector.shape_cast %281 : vector<16xf32> to vector<16x1xf32>
    %283 = vector.broadcast %282 : vector<16x1xf32> to vector<16x16xf32>
    %284 = arith.subf %280, %283 : vector<16x16xf32>
    %285 = math.exp %284 : vector<16x16xf32>
    %cst_125 = arith.constant dense<0.000000e+00> : vector<16xf32>
    %286 = vector.multi_reduction <add>, %285, %cst_125 [1] : vector<16x16xf32> to vector<16xf32>
    %287 = vector.shape_cast %286 : vector<16xf32> to vector<16x1xf32>
    %cst_126 = arith.constant dense<0.000000e+00> : vector<16x16xf32>
    %288 = tpu.matmul %285, %276, %cst_126 {dimension_numbers = #tpu.dot_dimension_numbers<[1], [0], [0], [1], [0, 0, 1, 1], [], []>} : vector<16x16xf32>, vector<16x16xf32>, vector<16x16xf32> -> vector<16x16xf32>
    %289 = tpu.reciprocal %287 {approx = true} : vector<16x1xf32> -> vector<16x1xf32>
    %290 = vector.broadcast %289 : vector<16x1xf32> to vector<16x16xf32>
    %291 = arith.mulf %288, %290 : vector<16x16xf32>
    %c16_127 = arith.constant 16 : index
    %c16_128 = arith.constant 16 : index
    %292 = vector.load %arg16[%c16_127, %c16_128] : memref<32x32xf32, #tpu.memory_space<vmem>>, vector<16x16xf32>
    tpu.vector_store %arg16[%c16_127, %c16_128], %291 {strides = array<i32>} : memref<32x32xf32, #tpu.memory_space<vmem>>, vector<16x16xf32>,
    %c0_129 = arith.constant 0 : index
    %c0_130 = arith.constant 0 : index
    %293 = vector.load %arg16[%c0_129, %c0_130] : memref<32x32xf32, #tpu.memory_space<vmem>>, vector<32x32xf32>
    %294 = arith.truncf %293 : vector<32x32xf32> to vector<32x32xbf16>
    %cst_131 = arith.constant dense<0.000000e+00> : vector<32x32xf32>
    %295 = tpu.matmul %294, %184, %cst_131 {dimension_numbers = #tpu.dot_dimension_numbers<[1], [0], [0], [1], [0, 0, 1, 1], [], []>} : vector<32x32xbf16>, vector<32x32xbf16>, vector<32x32xf32> -> vector<32x32xf32>
    %296 = arith.addf %180, %295 : vector<32x32xf32>
    %c1_132 = arith.constant 1 : index
    %c0_133 = arith.constant 0 : index
    %c0_134 = arith.constant 0 : index
    %297 = vector.load %arg9[%c1_132, %c0_133, %c0_134] : memref<2x1x32xf32, #tpu.memory_space<vmem>>, vector<1x1x32xf32>
    %298 = vector.shape_cast %297 : vector<1x1x32xf32> to vector<1x32xf32>
    %c1_135 = arith.constant 1 : index
    %c0_136 = arith.constant 0 : index
    %c0_137 = arith.constant 0 : index
    %299 = vector.load %arg10[%c1_135, %c0_136, %c0_137] : memref<2x1x32xf32, #tpu.memory_space<vmem>>, vector<1x1x32xf32>
    %300 = vector.shape_cast %299 : vector<1x1x32xf32> to vector<1x32xf32>
    %cst_138 = arith.constant dense<0.000000e+00> : vector<32xf32>
    %301 = vector.multi_reduction <add>, %296, %cst_138 [1] : vector<32x32xf32> to vector<32xf32>
    %302 = vector.shape_cast %301 : vector<32xf32> to vector<32x1xf32>
    %cst_139 = arith.constant 3.200000e+01 : f32
    %303 = vector.broadcast %cst_139 : f32 to vector<32x1xf32>
    %304 = arith.divf %302, %303 : vector<32x1xf32>
    %305 = vector.broadcast %304 : vector<32x1xf32> to vector<32x32xf32>
    %306 = arith.subf %296, %305 : vector<32x32xf32>
    %307 = arith.mulf %306, %306 : vector<32x32xf32>
    %cst_140 = arith.constant dense<0.000000e+00> : vector<32xf32>
    %308 = vector.multi_reduction <add>, %307, %cst_140 [1] : vector<32x32xf32> to vector<32xf32>
    %309 = vector.shape_cast %308 : vector<32xf32> to vector<32x1xf32>
    %cst_141 = arith.constant 3.200000e+01 : f32
    %310 = vector.broadcast %cst_141 : f32 to vector<32x1xf32>
    %311 = arith.divf %309, %310 : vector<32x1xf32>
    %312 = vector.broadcast %304 : vector<32x1xf32> to vector<32x32xf32>
    %313 = arith.subf %296, %312 : vector<32x32xf32>
    %cst_142 = arith.constant 9.99999974E-6 : f32
    %314 = vector.broadcast %cst_142 : f32 to vector<32x1xf32>
    %315 = arith.addf %311, %314 : vector<32x1xf32>
    %316 = math.rsqrt %315 : vector<32x1xf32>
    %317 = vector.broadcast %316 : vector<32x1xf32> to vector<32x32xf32>
    %318 = arith.mulf %313, %317 : vector<32x32xf32>
    %319 = vector.broadcast %298 : vector<1x32xf32> to vector<32x32xf32>
    %320 = arith.mulf %318, %319 : vector<32x32xf32>
    %321 = vector.broadcast %300 : vector<1x32xf32> to vector<32x32xf32>
    %322 = arith.addf %320, %321 : vector<32x32xf32>
    %323 = arith.truncf %322 : vector<32x32xf32> to vector<32x32xbf16>
    %cst_143 = arith.constant dense<0.000000e+00> : vector<32x128xf32>
    %324 = tpu.matmul %323, %186, %cst_143 {dimension_numbers = #tpu.dot_dimension_numbers<[1], [0], [0], [1], [0, 0, 1, 1], [], []>} : vector<32x32xbf16>, vector<32x128xbf16>, vector<32x128xf32> -> vector<32x128xf32>
    %325 = arith.mulf %324, %324 : vector<32x128xf32>
    %326 = arith.mulf %324, %325 : vector<32x128xf32>
    %cst_144 = arith.constant 4.471500e-02 : f32
    %327 = vector.broadcast %cst_144 : f32 to vector<32x128xf32>
    %328 = arith.mulf %327, %326 : vector<32x128xf32>
    %329 = arith.addf %324, %328 : vector<32x128xf32>
    %cst_145 = arith.constant 0.797884583 : f32
    %330 = vector.broadcast %cst_145 : f32 to vector<32x128xf32>
    %331 = arith.mulf %330, %329 : vector<32x128xf32>
    %332 = math.tanh %331 : vector<32x128xf32>
    %cst_146 = arith.constant 1.000000e+00 : f32
    %333 = vector.broadcast %cst_146 : f32 to vector<32x128xf32>
    %334 = arith.addf %333, %332 : vector<32x128xf32>
    %cst_147 = arith.constant 5.000000e-01 : f32
    %335 = vector.broadcast %cst_147 : f32 to vector<32x128xf32>
    %336 = arith.mulf %335, %334 : vector<32x128xf32>
    %337 = arith.mulf %324, %336 : vector<32x128xf32>
    %338 = arith.truncf %337 : vector<32x128xf32> to vector<32x128xbf16>
    %cst_148 = arith.constant dense<0.000000e+00> : vector<32x32xf32>
    %339 = tpu.matmul %338, %188, %cst_148 {dimension_numbers = #tpu.dot_dimension_numbers<[1], [0], [0], [1], [0, 0, 1, 1], [], []>} : vector<32x128xbf16>, vector<128x32xbf16>, vector<32x32xf32> -> vector<32x32xf32>
    %340 = arith.addf %296, %339 : vector<32x32xf32>
    %c0_149 = arith.constant 0 : index
    %c0_150 = arith.constant 0 : index
    %341 = vector.load %arg11[%c0_149, %c0_150] : memref<1x32xf32, #tpu.memory_space<vmem>>, vector<1x32xf32>
    %c0_151 = arith.constant 0 : index
    %c0_152 = arith.constant 0 : index
    %342 = vector.load %arg12[%c0_151, %c0_152] : memref<1x32xf32, #tpu.memory_space<vmem>>, vector<1x32xf32>
    %cst_153 = arith.constant dense<0.000000e+00> : vector<32xf32>
    %343 = vector.multi_reduction <add>, %340, %cst_153 [1] : vector<32x32xf32> to vector<32xf32>
    %344 = vector.shape_cast %343 : vector<32xf32> to vector<32x1xf32>
    %cst_154 = arith.constant 3.200000e+01 : f32
    %345 = vector.broadcast %cst_154 : f32 to vector<32x1xf32>
    %346 = arith.divf %344, %345 : vector<32x1xf32>
    %347 = vector.broadcast %346 : vector<32x1xf32> to vector<32x32xf32>
    %348 = arith.subf %340, %347 : vector<32x32xf32>
    %349 = arith.mulf %348, %348 : vector<32x32xf32>
    %cst_155 = arith.constant dense<0.000000e+00> : vector<32xf32>
    %350 = vector.multi_reduction <add>, %349, %cst_155 [1] : vector<32x32xf32> to vector<32xf32>
    %351 = vector.shape_cast %350 : vector<32xf32> to vector<32x1xf32>
    %cst_156 = arith.constant 3.200000e+01 : f32
    %352 = vector.broadcast %cst_156 : f32 to vector<32x1xf32>
    %353 = arith.divf %351, %352 : vector<32x1xf32>
    %354 = vector.broadcast %346 : vector<32x1xf32> to vector<32x32xf32>
    %355 = arith.subf %340, %354 : vector<32x32xf32>
    %cst_157 = arith.constant 9.99999974E-6 : f32
    %356 = vector.broadcast %cst_157 : f32 to vector<32x1xf32>
    %357 = arith.addf %353, %356 : vector<32x1xf32>
    %358 = math.rsqrt %357 : vector<32x1xf32>
    %359 = vector.broadcast %358 : vector<32x1xf32> to vector<32x32xf32>
    %360 = arith.mulf %355, %359 : vector<32x32xf32>
    %361 = vector.broadcast %341 : vector<1x32xf32> to vector<32x32xf32>
    %362 = arith.mulf %360, %361 : vector<32x32xf32>
    %363 = vector.broadcast %342 : vector<1x32xf32> to vector<32x32xf32>
    %364 = arith.addf %362, %363 : vector<32x32xf32>
    %c0_158 = arith.constant 0 : index
    %c0_159 = arith.constant 0 : index
    %365 = vector.load %arg14[%c0_158, %c0_159] : memref<32x32xf32, #tpu.memory_space<vmem>>, vector<32x32xf32>
    tpu.vector_store %arg14[%c0_158, %c0_159], %364 {strides = array<i32>} : memref<32x32xf32, #tpu.memory_space<vmem>>, vector<32x32xf32>,
    %366 = arith.truncf %364 : vector<32x32xf32> to vector<32x32xbf16>
    %c0_160 = arith.constant 0 : index
    %c0_161 = arith.constant 0 : index
    %367 = vector.load %arg13[%c0_160, %c0_161] : memref<32x128xbf16, #tpu.memory_space<vmem>>, vector<32x128xbf16>
    %cst_162 = arith.constant dense<0.000000e+00> : vector<32x128xf32>
    %368 = tpu.matmul %366, %367, %cst_162 {dimension_numbers = #tpu.dot_dimension_numbers<[1], [0], [0], [1], [0, 0, 1, 1], [], []>} : vector<32x32xbf16>, vector<32x128xbf16>, vector<32x128xf32> -> vector<32x128xf32>
    %c0_163 = arith.constant 0 : index
    %c0_164 = arith.constant 0 : index
    %369 = vector.load %arg15[%c0_163, %c0_164] : memref<32x128xf32, #tpu.memory_space<vmem>>, vector<32x128xf32>
    tpu.vector_store %arg15[%c0_163, %c0_164], %368 {strides = array<i32>} : memref<32x128xf32, #tpu.memory_space<vmem>>, vector<32x128xf32>,
    return
  }
}

</mosaic_0001>

<bundles_post_ra>
// kernel: proposal_forward.1
= control target key start
LH: loop header
LB: loop body
LE: loop exit
PB: predicated region body
PF: predicated region fallthrough
CT: control target
= control target key end

     0   :  { %v3780_v0 = vmov 0   ;;  %v54_v13 = vlaneseq  ;;  %v3781_v19 = vmov 1.0|1.0   ;;  %vm234_vm6 = vcmask 261120   ;;  %s3782_s20 = smov 96   ;;  %s3783_s21 = smov 64   ;;  %s4471_s0 = inlined_call_operand.vmem [shape: s32[32,1], index: 0, kind: input, shape index: {}]   ;;  %s4472_s1 = inlined_call_operand.vmem [shape: bf16[128,32], index: 1, kind: input, shape index: {}]   ;;  %s4473_s2 = inlined_call_operand.vmem [shape: f32[64,32], index: 2, kind: input, shape index: {}]   ;;  %s4474_s3 = inlined_call_operand.vmem [shape: bf16[2,32,96], index: 3, kind: input, shape index: {}]   ;;  %s4475_s7 = inlined_call_operand.vmem [shape: f32[2,1,32], index: 7, kind: input, shape index: {}]   ;;  %s4476_s8 = inlined_call_operand.vmem [shape: f32[2,1,32], index: 8, kind: input, shape index: {}]   ;;  %s4477_s4 = inlined_call_operand.vmem [shape: bf16[2,32,32], index: 4, kind: input, shape index: {}]   ;;  %s4478_s5 = inlined_call_operand.vmem [shape: bf16[2,32,128], index: 5, kind: input, shape index: {}]   ;;  %s4479_s9 = inlined_call_operand.vmem [shape: f32[2,1,32], index: 9, kind: input, shape index: {}]   ;;  %s4480_s10 = inlined_call_operand.vmem [shape: f32[2,1,32], index: 10, kind: input, shape index: {}]   ;;  %s4481_s6 = inlined_call_operand.vmem [shape: bf16[2,128,32], index: 6, kind: input, shape index: {}]   ;;  %s4482_s13 = inlined_call_operand.vmem [shape: bf16[32,128], index: 13, kind: input, shape index: {}]   ;;  %s4483_s11 = inlined_call_operand.vmem [shape: f32[1,32], index: 11, kind: input, shape index: {}]   ;;  %s4484_s12 = inlined_call_operand.vmem [shape: f32[1,32], index: 12, kind: input, shape index: {}]   ;;  %s4485_s14 = inlined_call_operand.vmem [shape: f32[32,32], index: 14, kind: output, shape index: {0}]   ;;  %s4486_s15 = inlined_call_operand.vmem [shape: f32[32,128], index: 15, kind: output, shape index: {1}]  }
   0x1   :  { %3621 = vset.pattern.permute.xlu1 %v3780_v0  ;;  %3620 = vset.pattern.permute.xlu0 %v3780_v0  ;;  %v52_v1 = vld [vmem:[%s4471_s0 + $0x10] sm:$0xff]  ;;  %v50_v2 = vld [vmem:[%s4471_s0] sm:$0xff]  ;;  %v53_v3 = vld [vmem:[%s4471_s0 + $0x18] sm:$0xff]  ;;  %vm383_vm7 = vcmask 130048   ;;  %s3784_s22 = smov 80   ;;  %s3786_s23 = smov 112  }
   0x2   :  { %63 = vperm.xlu1 %3621, %v52_v1   ;;  %57 = vperm.xlu0 %3620, %v50_v2   ;;  %v51_v4 = vld [vmem:[%s4471_s0 + $0x8] sm:$0xff]  ;;  %v3622_v5 = vld [vmem:[%s4472_s1 + $0x38] sm:$0xff]   ;;  %v3623_v6 = vld [vmem:[%s4472_s1 + $0x30] sm:$0xff]   ;;  %v3906_v16 = vand.u32 127, %v54_v13  ;;  %s3787_s24 = smov 48   ;;  %s3788_s25 = smov 16  }
   0x3   :  { %3383 = vmatprep.subr.bf16.mxu0 %v3622_v5  ;;  %v3624_v7 = vld [vmem:[%s4472_s1 + $0x28] sm:$0xff]   ;;  %v3625_v8 = vld [vmem:[%s4472_s1 + $0x20] sm:$0xff]   ;;  %v3626_v9 = vld [vmem:[%s4472_s1 + $0x18] sm:$0xff]   ;;  %vm794_vm10 = vcmask 261248  }
   0x4   :  { %3384 = vmatpush3.bf16.msra.mxu0 %v3622_v5  ;;  %v3627_v10 = vld [vmem:[%s4472_s1 + $0x10] sm:$0xff]   ;;  %v3628_v11 = vld [vmem:[%s4472_s1 + $0x8] sm:$0xff]   ;;  %v3629_v12 = vld [vmem:[%s4472_s1] sm:$0xff]  }
   0x5   :  { %3385 = vmatprep.subr.bf16.mxu0 %v3623_v6  ;;  %v98_v21 = vld [vmem:[%s4473_s2] sm:$0xff]  ;;  %v99_v27 = vld [vmem:[%s4473_s2 + $0x8] sm:$0xff] }
   0x6   :  { %66 = vperm.xlu1 %3621, %v53_v3   ;;  %60 = vperm.xlu0 %3620, %v51_v4   ;;  %v3630_v54 = vld [vmem:[%s4474_s3 + $0x8] sm:$0xff]   ;;  %v3631_v55 = vld [vmem:[%s4474_s3] sm:$0xff]  }
   0x7   :  { %3403 = vmatprep.subr.bf16.mxu1 %v3630_v54 }
   0x8   :  { %3386 = vmatpush3.bf16.msra.mxu0 %v3623_v6  ;;  %3404 = vmatpush3.bf16.msra.mxu1 %v3630_v54  ;;  %v3127_v6 = vld [vmem:[%s4475_s7] ss:$0 sm:$0xff] }
   0x9   :  { %3387 = vmatprep.subr.bf16.mxu0 %v3624_v7  ;;  %3405 = vmatprep.subr.bf16.mxu1 %v3631_v55 }
   0xc   :  { %3388 = vmatpush3.bf16.msra.mxu0 %v3624_v7  ;;  %3406 = vmatpush3.bf16.msra.mxu1 %v3631_v55 }
   0xd   :  { %3389 = vmatprep.subr.bf16.mxu0 %v3625_v8 }
  0x10   :  { %3390 = vmatpush3.bf16.msra.mxu0 %v3625_v8 }
  0x11   :  { %3391 = vmatprep.subr.bf16.mxu0 %v3626_v9 }
  0x14   :  { %3392 = vmatpush3.bf16.msra.mxu0 %v3626_v9 }
  0x15   :  { %3393 = vmatprep.subr.bf16.mxu0 %v3627_v10 }
  0x18   :  { %3394 = vmatpush3.bf16.msra.mxu0 %v3627_v10 }
  0x19   :  { %3395 = vmatprep.subr.bf16.mxu0 %v3628_v11 }
  0x1c   :  { %3396 = vmatpush3.bf16.msra.mxu0 %v3628_v11 }
  0x1d   :  { %3397 = vmatprep.subr.bf16.mxu0 %v3629_v12 }
  0x20   :  { %3398 = vmatpush3.bf16.msra.mxu0 %v3629_v12  ;;  %v3128_v12 = vld [vmem:[%s4476_s8] ss:$0 sm:$0xff] }
  0x7d   :  { %v64_v14 = vpop.permute.xlu1 %63  ;;  %v58_v15 = vpop.permute.xlu0 %57 }
  0x7e   :  { %vm70_vm0 = vcmp.eq.s32.totalorder %v3906_v16, %v64_v14  ;;  %vm68_vm4 = vcmp.eq.s32.totalorder %v3906_v16, %v58_v15 }
  0x81   :  { %v67_v17 = vpop.permute.xlu1 %66  ;;  %v61_v18 = vpop.permute.xlu0 %60 }
  0x82   :  { %vm71_vm1 = vcmp.eq.s32.totalorder %v3906_v16, %v67_v17  ;;  %vm69_vm2 = vcmp.eq.s32.totalorder %v3906_v16, %v61_v18 }
  0x83   :  { %vm3125_vm3 = vmpackc.low %vm71_vm1, %vm70_vm0 }
  0x84   :  { %vm3123_vm5 = vmpackc.low %vm69_vm2, %vm68_vm4 }
  0x85   :  { %3399 = vmatprep.mubr.msk.bf16.mxu0 %vm3123_vm5, %v3781_v19 }
  0x86   :  { %3400 = vmatmul.mubr.msk.bf16.vlgmr.msra.gmra.mxu0 %vm3125_vm3, %v3781_v19 }
 0x146   :  { %v3401_v20 = vpop.f32.mrf.mxu0 }
 0x147   :  { %v3917_v25 = vadd.f32 %v3401_v20, %v98_v21 }
 0x148   :  { %v182_v22 = vpop.f32.mrf.mxu0 }
 0x149   :  { %v3915_v23 = vadd.f32 %v182_v22, %v98_v21  ;;  %v241_v32 = vsel %vm234_vm6, %v3917_v25, 0.0 }
 0x14a   :  { %v3402_v24 = vpop.f32.mrf.mxu0 }
 0x14b   :  { %v235_v26 = vsel %vm234_vm6, %v3915_v23, 0.0  ;;  %v3926_v30 = vadd.f32 %v3402_v24, %v99_v27 }
 0x14c   :  { %v185_v28 = vpop.f32.mrf.mxu0  ;;  %236 = vadd.xlane.f32.xlu0 %v235_v26 }
 0x14d   :  { %v3924_v29 = vadd.f32 %v185_v28, %v99_v27  ;;  %v244_v33 = vsel %vm234_vm6, %v3926_v30, 0.0 }
 0x14f   :  { %v238_v31 = vsel %vm234_vm6, %v3924_v29, 0.0 }
 0x150   :  { %239 = vadd.xlane.f32.xlu1 %v238_v31  ;;  %242 = vadd.xlane.f32.xlu0 %v241_v32 }
 0x154   :  { %245 = vadd.xlane.f32.xlu0 %v244_v33 }
 0x1d5   :  { %v237_v34 = vpop.xlane.xlu0 %236 }
 0x1d6   :  { %v248_v35 = vmul.f32 0.03125, %v237_v34 }
 0x1d8   :  { %v252_v36 = vsub.f32 %v3915_v23, %v248_v35 }
 0x1d9   :  { %v240_v37 = vpop.xlane.xlu1 %239  ;;  %v243_v38 = vpop.xlane.xlu0 %242 }
 0x1da   :  { %v249_v39 = vmul.f32 0.03125, %v240_v37  ;;  %v250_v40 = vmul.f32 0.03125, %v243_v38  ;;  %v256_v41 = vmul.f32 %v252_v36, %v252_v36  ;;  %v198_v37 = vshrl.u32 %v54_v13, 7 }
 0x1dc   :  { %v253_v42 = vsub.f32 %v3924_v29, %v249_v39  ;;  %v254_v43 = vsub.f32 %v3917_v25, %v250_v40  ;;  %v260_v44 = vsel %vm234_vm6, %v256_v41, 0.0  ;;  %v199_v38 = vadd.s32 8, %v198_v37 }
 0x1dd   :  { %261 = vadd.xlane.f32.xlu1 %v260_v44  ;;  %v246_v45 = vpop.xlane.xlu0 %245  ;;  %vm200_vm9 = vcmp.le.s32.totalorder %v3906_v16, %v198_v37  ;;  %v3785_v40 = vmov -1e+30  }
 0x1de   :  { %v251_v46 = vmul.f32 0.03125, %v246_v45  ;;  %v257_v47 = vmul.f32 %v253_v42, %v253_v42  ;;  %v258_v48 = vmul.f32 %v254_v43, %v254_v43  ;;  %vm201_vm8 = vcmp.le.s32.totalorder %v3906_v16, %v199_v38 }
 0x1df   :  { %v3981_v41 = vsel %vm201_vm8, 0.0, %v3785_v40  ;;  %v3983_v44 = vsel %vm200_vm9, 0.0, %v3785_v40 }
 0x1e0   :  { %v255_v49 = vsub.f32 %v3926_v30, %v251_v46  ;;  %v263_v50 = vsel %vm234_vm6, %v257_v47, 0.0  ;;  %v266_v51 = vsel %vm234_vm6, %v258_v48, 0.0 }
 0x1e1   :  { %264 = vadd.xlane.f32.xlu0 %v263_v50  ;;  %267 = vadd.xlane.f32.xlu1 %v266_v51 }
 0x1e2   :  { %v259_v52 = vmul.f32 %v255_v49, %v255_v49 }
 0x1e4   :  { %v269_v53 = vsel %vm234_vm6, %v259_v52, 0.0 }
 0x1e5   :  { %270 = vadd.xlane.f32.xlu0 %v269_v53 }
 0x266   :  { %v262_v56 = vpop.xlane.xlu1 %261 }
 0x267   :  { %v272_v57 = vmul.f32 0.03125, %v262_v56 }
 0x269   :  { %v276_v58 = vadd.f32 1e-05, %v272_v57 }
 0x26a   :  { %v268_v59 = vpop.xlane.xlu1 %267  ;;  %v265_v60 = vpop.xlane.xlu0 %264 }
 0x26b   :  { %3660 = vrsqrt.f32 %v276_v58  ;;  %v274_v61 = vmul.f32 0.03125, %v268_v59  ;;  %v273_v62 = vmul.f32 0.03125, %v265_v60 }
 0x26d   :  { %v278_v63 = vadd.f32 1e-05, %v274_v61  ;;  %v277_v0 = vadd.f32 1e-05, %v273_v62 }
 0x26e   :  { %v271_v1 = vpop.xlane.xlu0 %270 }
 0x26f   :  { %3662 = vrsqrt.f32 %v278_v63  ;;  %v275_v2 = vmul.f32 0.03125, %v271_v1 }
 0x270   :  { %3664 = vrsqrt.f32 %v277_v0 }
 0x271   :  { %v279_v3 = vadd.f32 1e-05, %v275_v2 }
 0x273   :  { %3666 = vrsqrt.f32 %v279_v3 }
 0x278   :  { %v3661_v4 = vpop.eup %3660 }
 0x279   :  { %v284_v5 = vmul.f32 %v3661_v4, %v252_v36 }
 0x27b   :  { %v294_v11 = vmul.f32 %v3127_v6, %v284_v5 }
 0x27c   :  { %v3663_v7 = vpop.eup %3662 }
 0x27d   :  { %v3665_v8 = vpop.eup %3664  ;;  %v286_v9 = vmul.f32 %v3663_v7, %v254_v43  ;;  %v304_v19 = vadd.f32 %v3128_v12, %v294_v11 }
 0x27e   :  { %v285_v10 = vmul.f32 %v3665_v8, %v253_v42 }
 0x27f   :  { %v296_v18 = vmul.f32 %v3127_v6, %v286_v9 }
 0x280   :  { %v3667_v14 = vpop.eup %3666  ;;  %v295_v15 = vmul.f32 %v3127_v6, %v285_v10 }
 0x281   :  { %v287_v17 = vmul.f32 %v3667_v14, %v255_v49  ;;  %v306_v24 = vadd.f32 %v3128_v12, %v296_v18 }
 0x282   :  { %v305_v20 = vadd.f32 %v3128_v12, %v295_v15 }
 0x283   :  { %v297_v21 = vmul.f32 %v3127_v6, %v287_v17 }
 0x284   :  { %v308_v22 = vpack.c.bf16 %v305_v20, %v304_v19 }
 0x285   :  { %v307_v26 = vadd.f32 %v3128_v12, %v297_v21 }
 0x286   :  { %3407 = vmatprep.mubr.msk.bf16.mxu1 %vm234_vm6, %v308_v22 }
 0x287   :  { %v309_v27 = vpack.c.bf16 %v307_v26, %v306_v24 }
 0x289   :  { %3408 = vmatmul.mubr.msk.bf16.vlgmr.msra.gmra.mxu1 %vm234_vm6, %v309_v27 }
 0x349   :  { %v3956_v28 = vpop.f32.mrf.mxu1 }
 0x34a   :  { %3443 = vmatprep.mubr.msk.f32.mxu0 %vm383_vm7, %v3956_v28 }
 0x34b   :  { %v3960_v31 = vpop.f32.mrf.mxu1 }
 0x34c   :  { %379 = vrot.lane.b32.xlu0 %v3960_v31, %s3782_s20  ;;  %3415 = vmatprep.mubr.msk.f32.mxu1 %vm383_vm7, %v3960_v31 }
 0x34d   :  { %v3966_v32 = vpop.f32.mrf.mxu1 }
 0x34f   :  { %v365_v33 = vpop.f32.mrf.mxu1 }
 0x350   :  { %381 = vrot.lane.b32.xlu1 %v365_v33, %s3782_s20 }
 0x354   :  { %491 = vrot.lane.b32.xlu1 %v365_v33, %s3783_s21 }
 0x358   :  { %588 = vrot.lane.b32.xlu1 %v365_v33, %s3784_s22 }
 0x35c   :  { %586 = vrot.lane.b32.xlu1 %v3960_v31, %s3784_s22 }
 0x3be   :  { %v380_v35 = vpop.permute.xlu0 %379 }
 0x3c2   :  { %v382_v34 = vpop.permute.xlu1 %381 }
 0x3c3   :  { %3411 = vmatprep.subr.msk.mxu1 %vm383_vm7, %v382_v34 }
 0x3c4   :  { %3412 = vmatpush3.xpose.msk.msra.mxu1 %vm383_vm7, %v382_v34 }
 0x3c5   :  { %3413 = vmatprep.subr.msk.mxu1 %vm383_vm7, %v380_v35 }
 0x3c6   :  { %v492_v36 = vpop.permute.xlu1 %491 }
 0x3c8   :  { %3414 = vmatpush3.xpose.msk.msra.mxu1 %vm383_vm7, %v380_v35 }
 0x3c9   :  { %3418 = vmatprep.subr.mxu1 %v492_v36 }
 0x3ca   :  { %v589_v16 = vpop.permute.xlu1 %588 }
 0x3cb   :  { %3416 = vmatmul.mubr.msk.f32.vlgmr.msra.gmra.mxu1 %vm383_vm7, %v365_v33 }
 0x3cc   :  { %3419 = vmatpush3.msra.mxu1 %v492_v36 }
 0x3ce   :  { %v587_v49 = vpop.permute.xlu1 %586 }
 0x48b   :  { %v3417_v39 = vpop.f32.mrf.mxu1 }
 0x48c   :  { %v468_v42 = vmul.f32 0.25, %v3417_v39 }
 0x48d   :  { %v458_v43 = vpop.f32.mrf.mxu1 }
 0x48e   :  { %v467_v45 = vmul.f32 0.25, %v458_v43  ;;  %v470_v46 = vadd.f32 %v468_v42, %v3981_v41 }
 0x490   :  { %v474_v47 = vsel %vm383_vm7, %v470_v46, -inf  ;;  %v469_v13 = vadd.f32 %v467_v45, %v3983_v44 }
 0x491   :  { %475 = vmax.xlane.f32.xlu0 %v474_v47 }
 0x492   :  { %v471_v48 = vsel %vm383_vm7, %v469_v13, -inf }
 0x493   :  { %472 = vmax.xlane.f32.xlu1 %v471_v48 }
 0x4a4   :  { %582 = vrot.lane.b32.xlu1 %v3960_v31, %s3786_s23 }
 0x4a7   :  { %489 = vrot.lane.b32.xlu0 %v3960_v31, %s3783_s21 }
 0x4a8   :  { %799 = vrot.lane.b32.xlu1 %v3956_v28, %s3782_s20 }
 0x4ab   :  { %801 = vrot.lane.b32.xlu0 %v3966_v32, %s3782_s20 }
 0x4ac   :  { %697 = vrot.lane.b32.xlu1 %v365_v33, %s3787_s24 }
 0x4af   :  { %584 = vrot.lane.b32.xlu0 %v365_v33, %s3786_s23 }
 0x51a   :  { %v476_v50 = vpop.xlane.xlu0 %475 }
 0x51b   :  { %v478_v51 = vsub.f32 %v470_v46, %v476_v50 }
 0x51c   :  { %v473_v52 = vpop.xlane.xlu1 %472 }
 0x51d   :  { %v477_v53 = vsub.f32 %v469_v13, %v473_v52  ;;  %v481_v54 = vmul.f32 1.442695, %v478_v51 }
 0x51e   :  { %v490_v55 = vpop.permute.xlu0 %489 }
 0x51f   :  { %v479_v56 = vmul.f32 1.442695, %v477_v53  ;;  %3420 = vmatprep.subr.mxu1 %v490_v55 }
 0x520   :  { %3421 = vmatpush3.msra.mxu1 %v490_v55  ;;  %v583_v57 = vpop.permute.xlu1 %582 }
 0x521   :  { %3668 = vpow2.f32 %v479_v56  ;;  %3425 = vmatprep.subr.msk.mxu1 %vm383_vm7, %v589_v16 }
 0x522   :  { %3670 = vpow2.f32 %v481_v54  ;;  %v802_v58 = vpop.permute.xlu0 %801 }
 0x523   :  { %3439 = vmatprep.subr.msk.mxu0 %vm383_vm7, %v802_v58 }
 0x524   :  { %3440 = vmatpush3.xpose.msk.msra.mxu0 %vm383_vm7, %v802_v58  ;;  %v800_v59 = vpop.permute.xlu1 %799 }
 0x525   :  { %3441 = vmatprep.subr.msk.mxu0 %vm383_vm7, %v800_v59 }
 0x526   :  { %v585_v63 = vpop.permute.xlu0 %584 }
 0x528   :  { %3442 = vmatpush3.xpose.msk.msra.mxu0 %vm383_vm7, %v800_v59  ;;  %v698_v62 = vpop.permute.xlu1 %697 }
 0x52b   :  { %3444 = vmatmul.mubr.msk.f32.vlgmr.msra.gmra.mxu0 %vm383_vm7, %v3966_v32 }
 0x52e   :  { %v4006_v60 = vpop.eup %3668 }
 0x52f   :  { %v4008_v61 = vpop.eup %3670  ;;  %3422 = vmatprep.mubr.msk.f32.mxu1 %vm383_vm7, %v4006_v60 }
 0x530   :  { %3423 = vmatmul.mubr.msk.f32.vlgmr.msra.gmra.mxu1 %vm383_vm7, %v4008_v61 }
 0x531   :  { %3426 = vmatpush3.xpose.msk.msra.mxu1 %vm383_vm7, %v589_v16  ;;  %3429 = vmatprep.mubr.msk.f32.mxu1 %vm383_vm7, %v583_v57 }
 0x532   :  { %3427 = vmatprep.subr.msk.mxu1 %vm383_vm7, %v587_v49 }
 0x535   :  { %3428 = vmatpush3.xpose.msk.msra.mxu1 %vm383_vm7, %v587_v49 }
 0x536   :  { %3432 = vmatprep.subr.mxu1 %v698_v62 }
 0x538   :  { %3430 = vmatmul.mubr.msk.f32.vlgmr.msra.gmra.mxu1 %vm383_vm7, %v585_v63 }
 0x539   :  { %3433 = vmatpush3.msra.mxu1 %v698_v62 }
 0x5eb   :  { %v3445_v0 = vpop.f32.mrf.mxu0 }
 0x5ec   :  { %v887_v2 = vmul.f32 0.25, %v3445_v0 }
 0x5ed   :  { %v877_v1 = vpop.f32.mrf.mxu0 }
 0x5ee   :  { %v886_v3 = vmul.f32 0.25, %v877_v1  ;;  %v889_v7 = vadd.f32 %v887_v2, %v3981_v41  ;;  %v483_v1 = vsel %vm383_vm7, %v4006_v60, 0.0 }
 0x5f0   :  { %v888_v4 = vadd.f32 %v886_v3, %v3983_v44  ;;  %v4020_v5 = vpop.f32.mrf.mxu1  ;;  %v893_v9 = vsel %vm383_vm7, %v889_v7, -inf }
 0x5f2   :  { %v890_v6 = vsel %vm383_vm7, %v888_v4, -inf  ;;  %v4024_v8 = vpop.f32.mrf.mxu1 }
 0x5f3   :  { %891 = vmax.xlane.f32.xlu0 %v890_v6 }
 0x5f7   :  { %894 = vmax.xlane.f32.xlu0 %v893_v9 }
 0x5f8   :  { %v3431_v10 = vpop.f32.mrf.mxu1 }
 0x5f9   :  { %v674_v11 = vmul.f32 0.25, %v3431_v10 }
 0x5fa   :  { %v664_v12 = vpop.f32.mrf.mxu1 }
 0x5fb   :  { %v673_v14 = vmul.f32 0.25, %v664_v12  ;;  %v676_v15 = vadd.f32 %v674_v11, %v3981_v41 }
 0x5fd   :  { %v680_v17 = vsel %vm383_vm7, %v676_v15, -inf  ;;  %v675_v18 = vadd.f32 %v673_v14, %v3983_v44 }
 0x5fe   :  { %681 = vmax.xlane.f32.xlu1 %v680_v17 }
 0x5ff   :  { %v677_v19 = vsel %vm383_vm7, %v675_v18, -inf }
 0x600   :  { %678 = vmax.xlane.f32.xlu0 %v677_v19 }
 0x60f   :  { %910 = vrot.lane.b32.xlu1 %v3966_v32, %s3783_s21 }
 0x613   :  { %908 = vrot.lane.b32.xlu1 %v3956_v28, %s3783_s21 }
 0x616   :  { %695 = vrot.lane.b32.xlu0 %v3960_v31, %s3787_s24 }
 0x617   :  { %1005 = vrot.lane.b32.xlu1 %v3956_v28, %s3784_s22 }
 0x61a   :  { %1007 = vrot.lane.b32.xlu0 %v3966_v32, %s3784_s22 }
 0x61b   :  { %1003 = vrot.lane.b32.xlu1 %v3966_v32, %s3786_s23 }
 0x61e   :  { %1001 = vrot.lane.b32.xlu0 %v3956_v28, %s3786_s23 }
 0x67c   :  { %v892_v20 = vpop.xlane.xlu0 %891 }
 0x67d   :  { %v896_v24 = vsub.f32 %v888_v4, %v892_v20 }
 0x67f   :  { %v898_v35 = vmul.f32 1.442695, %v896_v24 }
 0x680   :  { %v895_v21 = vpop.xlane.xlu0 %894 }
 0x681   :  { %v897_v31 = vsub.f32 %v889_v7, %v895_v21 }
 0x683   :  { %v900_v38 = vmul.f32 1.442695, %v897_v31 }
 0x687   :  { %v682_v22 = vpop.xlane.xlu1 %681 }
 0x688   :  { %v684_v26 = vsub.f32 %v676_v15, %v682_v22  ;;  %v486_v15 = vsel %vm383_vm7, %v4008_v61, 0.0 }
 0x689   :  { %v679_v27 = vpop.xlane.xlu0 %678 }
 0x68a   :  { %v683_v33 = vsub.f32 %v675_v18, %v679_v27  ;;  %v687_v34 = vmul.f32 1.442695, %v684_v26 }
 0x68b   :  { %v911_v39 = vpop.permute.xlu1 %910 }
 0x68c   :  { %v685_v36 = vmul.f32 1.442695, %v683_v33 }
 0x68d   :  { %v696_v37 = vpop.permute.xlu0 %695 }
 0x68e   :  { %3672 = vpow2.f32 %v685_v36  ;;  %3434 = vmatprep.subr.mxu1 %v696_v37 }
 0x68f   :  { %3674 = vpow2.f32 %v687_v34  ;;  %3435 = vmatpush3.msra.mxu1 %v696_v37  ;;  %v909_v45 = vpop.permute.xlu1 %908 }
 0x690   :  { %3676 = vpow2.f32 %v898_v35  ;;  %3446 = vmatprep.subr.mxu1 %v911_v39 }
 0x691   :  { %3678 = vpow2.f32 %v900_v38  ;;  %v1008_v42 = vpop.permute.xlu0 %1007 }
 0x693   :  { %v1006_v48 = vpop.permute.xlu1 %1005 }
 0x695   :  { %v1002_v13 = vpop.permute.xlu0 %1001 }
 0x697   :  { %v1004_v16 = vpop.permute.xlu1 %1003 }
 0x69b   :  { %v3673_v40 = vpop.eup %3672 }
 0x69c   :  { %v3675_v43 = vpop.eup %3674  ;;  %3436 = vmatprep.mubr.msk.f32.mxu1 %vm383_vm7, %v3673_v40  ;;  %v689_v0 = vsel %vm383_vm7, %v3673_v40, 0.0 }
 0x69d   :  { %v3677_v46 = vpop.eup %3676  ;;  %3437 = vmatmul.mubr.msk.f32.vlgmr.msra.gmra.mxu1 %vm383_vm7, %v3675_v43  ;;  %v692_v63 = vsel %vm383_vm7, %v3675_v43, 0.0 }
 0x69e   :  { %3447 = vmatpush3.msra.mxu1 %v911_v39  ;;  %3450 = vmatprep.mubr.msk.f32.mxu1 %vm383_vm7, %v3677_v46  ;;  %v3679_v47 = vpop.eup %3678  ;;  %v902_v2 = vsel %vm383_vm7, %v3677_v46, 0.0 }
 0x69f   :  { %3448 = vmatprep.subr.mxu1 %v909_v45  ;;  %v905_v17 = vsel %vm383_vm7, %v3679_v47, 0.0 }
 0x6a0   :  { %3449 = vmatpush3.msra.mxu1 %v909_v45 }
 0x6a1   :  { %3453 = vmatprep.subr.msk.mxu1 %vm383_vm7, %v1008_v42  ;;  %3451 = vmatmul.mubr.msk.f32.vlgmr.msra.gmra.mxu1 %vm383_vm7, %v3679_v47 }
 0x6a2   :  { %3454 = vmatpush3.xpose.msk.msra.mxu1 %vm383_vm7, %v1008_v42  ;;  %3457 = vmatprep.mubr.msk.f32.mxu1 %vm383_vm7, %v1002_v13 }
 0x6a3   :  { %3455 = vmatprep.subr.msk.mxu1 %vm383_vm7, %v1006_v48 }
 0x6a6   :  { %3456 = vmatpush3.xpose.msk.msra.mxu1 %vm383_vm7, %v1006_v48  ;;  %v3633_v48 = vld [vmem:[%s4477_s4] sm:$0xff]  }
 0x6a9   :  { %3458 = vmatmul.mubr.msk.f32.vlgmr.msra.gmra.mxu1 %vm383_vm7, %v1004_v16 }
 0x75d   :  { %v3438_v49 = vpop.f32.mrf.mxu1 }
 0x75f   :  { %v773_v50 = vpop.f32.mrf.mxu1 }
 0x761   :  { %v4055_v51 = vpop.f32.mrf.mxu1 }
 0x763   :  { %v4057_v52 = vpop.f32.mrf.mxu1 }
 0x769   :  { %v3459_v53 = vpop.f32.mrf.mxu1 }
 0x76a   :  { %v1093_v54 = vmul.f32 0.25, %v3459_v53 }
 0x76b   :  { %v1083_v55 = vpop.f32.mrf.mxu1 }
 0x76c   :  { %v1092_v56 = vmul.f32 0.25, %v1083_v55  ;;  %v1095_v57 = vadd.f32 %v1093_v54, %v3981_v41 }
 0x76e   :  { %v1099_v58 = vsel %vm383_vm7, %v1095_v57, -inf  ;;  %v1094_v59 = vadd.f32 %v1092_v56, %v3983_v44 }
 0x76f   :  { %1100 = vmax.xlane.f32.xlu1 %v1099_v58 }
 0x770   :  { %v1096_v62 = vsel %vm383_vm7, %v1094_v59, -inf }
 0x771   :  { %1097 = vmax.xlane.f32.xlu0 %v1096_v62 }
 0x780   :  { %1114 = vrot.lane.b32.xlu1 %v3956_v28, %s3787_s24 }
 0x787   :  { %1116 = vrot.lane.b32.xlu0 %v3966_v32, %s3787_s24 }
 0x7a4   :  { %693 = vadd.xlane.f32.xlu1 %v692_v63 }
 0x7a6   :  { %690 = vadd.xlane.f32.xlu0 %v689_v0 }
 0x7a8   :  { %484 = vadd.xlane.f32.xlu1 %v483_v1 }
 0x7ac   :  { %903 = vadd.xlane.f32.xlu1 %v902_v2 }
 0x7f8   :  { %v1101_v3 = vpop.xlane.xlu1 %1100 }
 0x7f9   :  { %v1103_v4 = vsub.f32 %v1095_v57, %v1101_v3 }
 0x7fa   :  { %v1098_v6 = vpop.xlane.xlu0 %1097 }
 0x7fb   :  { %v1102_v28 = vsub.f32 %v1094_v59, %v1098_v6  ;;  %v1106_v7 = vmul.f32 1.442695, %v1103_v4 }
 0x7fc   :  { %v1115_v10 = vpop.permute.xlu1 %1114 }
 0x7fd   :  { %v1104_v9 = vmul.f32 1.442695, %v1102_v28 }
 0x7fe   :  { %v1117_v32 = vpop.permute.xlu0 %1116 }
 0x7ff   :  { %3680 = vpow2.f32 %v1104_v9  ;;  %3460 = vmatprep.subr.mxu1 %v1117_v32 }
 0x800   :  { %3682 = vpow2.f32 %v1106_v7  ;;  %3461 = vmatpush3.msra.mxu1 %v1117_v32 }
 0x801   :  { %3462 = vmatprep.subr.mxu1 %v1115_v10 }
 0x802   :  { %3463 = vmatpush3.msra.mxu1 %v1115_v10 }
 0x80c   :  { %v3681_v11 = vpop.eup %3680 }
 0x80d   :  { %v3683_v60 = vpop.eup %3682  ;;  %3464 = vmatprep.mubr.msk.f32.mxu1 %vm383_vm7, %v3681_v11  ;;  %v1108_v12 = vsel %vm383_vm7, %v3681_v11, 0.0 }
 0x80e   :  { %1109 = vadd.xlane.f32.xlu0 %v1108_v12  ;;  %3465 = vmatmul.mubr.msk.f32.vlgmr.msra.gmra.mxu1 %vm383_vm7, %v3683_v60  ;;  %v1111_v14 = vsel %vm383_vm7, %v3683_v60, 0.0 }
 0x812   :  { %1112 = vadd.xlane.f32.xlu0 %v1111_v14 }
 0x816   :  { %487 = vadd.xlane.f32.xlu0 %v486_v15 }
 0x81a   :  { %906 = vadd.xlane.f32.xlu0 %v905_v17 }
 0x82d   :  { %v694_v18 = vpop.xlane.xlu1 %693 }
 0x82e   :  { %3684 = vrcp.f32 %v694_v18 }
 0x82f   :  { %v691_v19 = vpop.xlane.xlu0 %690 }
 0x830   :  { %3686 = vrcp.f32 %v691_v19 }
 0x831   :  { %v485_v20 = vpop.xlane.xlu1 %484 }
 0x832   :  { %3688 = vrcp.f32 %v485_v20 }
 0x835   :  { %v904_v21 = vpop.xlane.xlu1 %903 }
 0x836   :  { %3690 = vrcp.f32 %v904_v21 }
 0x83b   :  { %v3685_v22 = vpop.eup %3684 }
 0x83c   :  { %v785_v24 = vmul.f32 %v3685_v22, %v3438_v49 }
 0x83d   :  { %v3687_v26 = vpop.eup %3686 }
 0x83e   :  { %790 = vrot.lane.b32.xlu0 %v785_v24, %s3788_s25  ;;  %v784_v27 = vmul.f32 %v3687_v26, %v773_v50 }
 0x83f   :  { %v3689_v61 = vpop.eup %3688 }
 0x840   :  { %788 = vrot.lane.b32.xlu1 %v784_v27, %s3788_s25  ;;  %v578_v33 = vmul.f32 %v3689_v61, %v4024_v8  ;;  %v3634_v61 = vld [vmem:[%s4478_s5 + $0x8] sm:$0xff]  }
 0x842   :  { %580 = vst.msk [vmem:[#allocation2] sm:$0xff] %vm383_vm7, %v578_v33  ;;  %v3635_v33 = vld [vmem:[%s4478_s5] sm:$0xff]  }
 0x843   :  { %v3691_v31 = vpop.eup %3690 }
 0x844   :  { %v997_v34 = vmul.f32 %v3691_v31, %v4057_v52 }
 0x846   :  { %999 = vst.msk [vmem:[#allocation2 + $0x10] sm:$0xff] %vm383_vm7, %v997_v34 }
 0x897   :  { %v1110_v35 = vpop.xlane.xlu0 %1109 }
 0x89b   :  { %v1113_v36 = vpop.xlane.xlu0 %1112 }
 0x89f   :  { %v488_v37 = vpop.xlane.xlu0 %487 }
 0x8a0   :  { %3692 = vrcp.f32 %v488_v37 }
 0x8a3   :  { %v907_v38 = vpop.xlane.xlu0 %906 }
 0x8a4   :  { %3694 = vrcp.f32 %v907_v38 }
 0x8a5   :  { %3696 = vrcp.f32 %v1110_v35 }
 0x8a6   :  { %3698 = vrcp.f32 %v1113_v36 }
 0x8ad   :  { %v3693_v39 = vpop.eup %3692 }
 0x8ae   :  { %v579_v40 = vmul.f32 %v3693_v39, %v4020_v5  ;;  %v3632_v5 = vld [vmem:[%s4477_s4 + $0x8] sm:$0xff]  }
 0x8af   :  { %3467 = vmatprep.subr.bf16.mxu1 %v3632_v5 }
 0x8b0   :  { %581 = vst.msk [vmem:[#allocation2 + $0x8] sm:$0xff] %vm383_vm7, %v579_v40  ;;  %v791_v8 = vpop.permute.xlu0 %790  ;;  %3468 = vmatpush3.bf16.msra.mxu1 %v3632_v5 }
 0x8b1   :  { %v3695_v42 = vpop.eup %3694  ;;  %796 = vst.msk [vmem:[#allocation2 + $0x8] sm:$0xff] %vm794_vm10, %v791_v8  ;;  %3469 = vmatprep.subr.bf16.mxu1 %v3633_v48 }
 0x8b2   :  { %v789_v43 = vpop.permute.xlu1 %788  ;;  %v998_v45 = vmul.f32 %v3695_v42, %v4055_v51  ;;  %v3697_v49 = vpop.eup %3696 }
 0x8b3   :  { %795 = vst.msk [vmem:[#allocation2] sm:$0xff] %vm794_vm10, %v789_v43  ;;  %v3699_v52 = vpop.eup %3698 }
 0x8b4   :  { %1000 = vst.msk [vmem:[#allocation2 + $0x18] sm:$0xff] %vm383_vm7, %v998_v45  ;;  %3470 = vmatpush3.bf16.msra.mxu1 %v3633_v48 }
 0x8b5   :  { %3475 = vmatprep.subr.bf16.mxu1 %v3634_v61 }
 0x8b8   :  { %v1216_v47 = vld [vmem:[#allocation2 + $0x8] sm:$0xff] }
 0x8ba   :  { %v1215_v46 = vld [vmem:[#allocation2] sm:$0xff] }
 0x8bb   :  { %v1219_v13 = vpack.c.bf16 %v1216_v47, %v1215_v46 }
 0x8bd   :  { %3471 = vmatprep.mubr.msk.bf16.mxu1 %vm234_vm6, %v1219_v13  ;;  %v3161_v13 = vld [vmem:[%s4479_s9] ss:$0 sm:$0xff] }
 0x8ce   :  { %v3466_v16 = vpop.f32.mrf.mxu1 }
 0x8cf   :  { %v1204_v53 = vmul.f32 %v3699_v52, %v3466_v16 }
 0x8d0   :  { %v1192_v50 = vpop.f32.mrf.mxu1 }
 0x8d1   :  { %v1203_v51 = vmul.f32 %v3697_v49, %v1192_v50 }
 0x8d3   :  { %1207 = vrot.lane.b32.xlu1 %v1203_v51, %s3788_s25  ;;  %v3162_v51 = vld [vmem:[%s4480_s10] ss:$0 sm:$0xff] }
 0x8d7   :  { %1209 = vrot.lane.b32.xlu1 %v1204_v53, %s3788_s25 }
 0x945   :  { %v1208_v54 = vpop.permute.xlu1 %1207 }
 0x946   :  { %1213 = vst.msk [vmem:[#allocation2 + $0x10] sm:$0xff] %vm794_vm10, %v1208_v54 }
 0x949   :  { %v1210_v55 = vpop.permute.xlu1 %1209 }
 0x94a   :  { %1214 = vst.msk [vmem:[#allocation2 + $0x18] sm:$0xff] %vm794_vm10, %v1210_v55 }
 0x94d   :  { %v1217_v56 = vld [vmem:[#allocation2 + $0x10] sm:$0xff] }
 0x951   :  { %v1218_v57 = vld [vmem:[#allocation2 + $0x18] sm:$0xff] }
 0x952   :  { %v1220_v58 = vpack.c.bf16 %v1218_v57, %v1217_v56 }
 0x954   :  { %3472 = vmatmul.mubr.msk.bf16.vlgmr.msra.gmra.mxu1 %vm234_vm6, %v1220_v58 }
 0x955   :  { %3476 = vmatpush3.bf16.msra.mxu1 %v3634_v61 }
 0x956   :  { %3477 = vmatprep.subr.bf16.mxu1 %v3635_v33 }
 0x959   :  { %3478 = vmatpush3.bf16.msra.mxu1 %v3635_v33 }
 0xa14   :  { %v3473_v59 = vpop.f32.mrf.mxu1 }
 0xa15   :  { %v4107_v1 = vadd.f32 %v3473_v59, %v3917_v25 }
 0xa16   :  { %v1273_v62 = vpop.f32.mrf.mxu1 }
 0xa17   :  { %v4104_v63 = vadd.f32 %v1273_v62, %v3915_v23  ;;  %v1300_v28 = vsel %vm234_vm6, %v4107_v1, 0.0 }
 0xa18   :  { %v3474_v0 = vpop.f32.mrf.mxu1 }
 0xa19   :  { %v1294_v2 = vsel %vm234_vm6, %v4104_v63, 0.0  ;;  %v4115_v6 = vadd.f32 %v3474_v0, %v3926_v30 }
 0xa1a   :  { %1295 = vadd.xlane.f32.xlu0 %v1294_v2  ;;  %v1276_v3 = vpop.f32.mrf.mxu1 }
 0xa1b   :  { %v4112_v4 = vadd.f32 %v1276_v3, %v3924_v29  ;;  %v1303_v25 = vsel %vm234_vm6, %v4115_v6, 0.0  ;;  %v3636_v3 = vld [vmem:[%s4481_s6 + $0x38] sm:$0xff]  }
 0xa1c   :  { %3483 = vmatprep.subr.bf16.mxu0 %v3636_v3 }
 0xa1d   :  { %v1297_v23 = vsel %vm234_vm6, %v4112_v4, 0.0  ;;  %3484 = vmatpush3.bf16.msra.mxu0 %v3636_v3 }
 0xa1e   :  { %1301 = vadd.xlane.f32.xlu0 %v1300_v28  ;;  %1298 = vadd.xlane.f32.xlu1 %v1297_v23  ;;  %v3637_v28 = vld [vmem:[%s4481_s6 + $0x30] sm:$0xff]   ;;  %v3638_v23 = vld [vmem:[%s4481_s6 + $0x28] sm:$0xff]  }
 0xa1f   :  { %3485 = vmatprep.subr.bf16.mxu0 %v3637_v28 }
 0xa21   :  { %3486 = vmatpush3.bf16.msra.mxu0 %v3637_v28 }
 0xa22   :  { %1304 = vadd.xlane.f32.xlu0 %v1303_v25  ;;  %3487 = vmatprep.subr.bf16.mxu0 %v3638_v23  ;;  %v3639_v25 = vld [vmem:[%s4481_s6 + $0x20] sm:$0xff]  }
 0xa25   :  { %3488 = vmatpush3.bf16.msra.mxu0 %v3638_v23 }
 0xa26   :  { %3489 = vmatprep.subr.bf16.mxu0 %v3639_v25 }
 0xa29   :  { %3490 = vmatpush3.bf16.msra.mxu0 %v3639_v25 }
 0xaa3   :  { %v1296_v7 = vpop.xlane.xlu0 %1295 }
 0xaa4   :  { %v1306_v9 = vmul.f32 0.03125, %v1296_v7  ;;  %v3640_v7 = vld [vmem:[%s4481_s6 + $0x18] sm:$0xff]  }
 0xaa5   :  { %3491 = vmatprep.subr.bf16.mxu0 %v3640_v7 }
 0xaa6   :  { %v1310_v29 = vsub.f32 %v4104_v63, %v1306_v9  ;;  %3492 = vmatpush3.bf16.msra.mxu0 %v3640_v7  ;;  %v3641_v9 = vld [vmem:[%s4481_s6 + $0x10] sm:$0xff]  }
 0xaa7   :  { %v1302_v32 = vpop.xlane.xlu0 %1301  ;;  %v1299_v10 = vpop.xlane.xlu1 %1298  ;;  %3493 = vmatprep.subr.bf16.mxu0 %v3641_v9 }
 0xaa8   :  { %v1308_v30 = vmul.f32 0.03125, %v1302_v32  ;;  %v1307_v11 = vmul.f32 0.03125, %v1299_v10  ;;  %v1314_v60 = vmul.f32 %v1310_v29, %v1310_v29  ;;  %v3643_v32 = vld [vmem:[%s4481_s6] sm:$0xff]  }
 0xaaa   :  { %v1312_v12 = vsub.f32 %v4107_v1, %v1308_v30  ;;  %v1311_v14 = vsub.f32 %v4112_v4, %v1307_v11  ;;  %v1318_v15 = vsel %vm234_vm6, %v1314_v60, 0.0  ;;  %3494 = vmatpush3.bf16.msra.mxu0 %v3641_v9 }
 0xaab   :  { %v1305_v17 = vpop.xlane.xlu0 %1304  ;;  %1319 = vadd.xlane.f32.xlu1 %v1318_v15 }
 0xaac   :  { %v1309_v18 = vmul.f32 0.03125, %v1305_v17  ;;  %v1316_v19 = vmul.f32 %v1312_v12, %v1312_v12  ;;  %v1315_v20 = vmul.f32 %v1311_v14, %v1311_v14 }
 0xaae   :  { %v1313_v21 = vsub.f32 %v4115_v6, %v1309_v18  ;;  %v1324_v22 = vsel %vm234_vm6, %v1316_v19, 0.0  ;;  %v1321_v24 = vsel %vm234_vm6, %v1315_v20, 0.0 }
 0xaaf   :  { %1325 = vadd.xlane.f32.xlu1 %v1324_v22  ;;  %1322 = vadd.xlane.f32.xlu0 %v1321_v24 }
 0xab0   :  { %v1317_v26 = vmul.f32 %v1313_v21, %v1313_v21 }
 0xab2   :  { %v1327_v27 = vsel %vm234_vm6, %v1317_v26, 0.0 }
 0xab3   :  { %1328 = vadd.xlane.f32.xlu0 %v1327_v27 }
 0xb34   :  { %v1320_v31 = vpop.xlane.xlu1 %1319 }
 0xb35   :  { %v1330_v34 = vmul.f32 0.03125, %v1320_v31 }
 0xb37   :  { %v1334_v35 = vadd.f32 1e-05, %v1330_v34 }
 0xb38   :  { %v1323_v36 = vpop.xlane.xlu0 %1322  ;;  %v1326_v37 = vpop.xlane.xlu1 %1325 }
 0xb39   :  { %3700 = vrsqrt.f32 %v1334_v35  ;;  %v1331_v38 = vmul.f32 0.03125, %v1323_v36  ;;  %v1332_v39 = vmul.f32 0.03125, %v1326_v37 }
 0xb3b   :  { %v1335_v40 = vadd.f32 1e-05, %v1331_v38  ;;  %v1336_v8 = vadd.f32 1e-05, %v1332_v39 }
 0xb3c   :  { %v1329_v42 = vpop.xlane.xlu0 %1328 }
 0xb3d   :  { %3702 = vrsqrt.f32 %v1335_v40  ;;  %v1333_v43 = vmul.f32 0.03125, %v1329_v42 }
 0xb3e   :  { %3704 = vrsqrt.f32 %v1336_v8 }
 0xb3f   :  { %v1337_v45 = vadd.f32 1e-05, %v1333_v43 }
 0xb41   :  { %3706 = vrsqrt.f32 %v1337_v45 }
 0xb46   :  { %v3701_v46 = vpop.eup %3700 }
 0xb47   :  { %v1342_v47 = vmul.f32 %v3701_v46, %v1310_v29  ;;  %v3642_v29 = vld [vmem:[%s4481_s6 + $0x8] sm:$0xff]  }
 0xb48   :  { %3495 = vmatprep.subr.bf16.mxu0 %v3642_v29 }
 0xb49   :  { %v1352_v49 = vmul.f32 %v3161_v13, %v1342_v47  ;;  %3496 = vmatpush3.bf16.msra.mxu0 %v3642_v29 }
 0xb4a   :  { %v3703_v5 = vpop.eup %3702  ;;  %3497 = vmatprep.subr.bf16.mxu0 %v3643_v32 }
 0xb4b   :  { %v3705_v48 = vpop.eup %3704  ;;  %v1343_v16 = vmul.f32 %v3703_v5, %v1311_v14  ;;  %v1362_v55 = vadd.f32 %v3162_v51, %v1352_v49 }
 0xb4c   :  { %v1344_v50 = vmul.f32 %v3705_v48, %v1312_v12 }
 0xb4d   :  { %v1353_v52 = vmul.f32 %v3161_v13, %v1343_v16  ;;  %3498 = vmatpush3.bf16.msra.mxu0 %v3643_v32 }
 0xb4e   :  { %v3707_v53 = vpop.eup %3706  ;;  %v1354_v57 = vmul.f32 %v3161_v13, %v1344_v50 }
 0xb4f   :  { %v1345_v54 = vmul.f32 %v3707_v53, %v1313_v21  ;;  %v1363_v56 = vadd.f32 %v3162_v51, %v1353_v52 }
 0xb50   :  { %v1364_v62 = vadd.f32 %v3162_v51, %v1354_v57 }
 0xb51   :  { %v1366_v58 = vpack.c.bf16 %v1363_v56, %v1362_v55  ;;  %v1355_v59 = vmul.f32 %v3161_v13, %v1345_v54 }
 0xb53   :  { %3479 = vmatprep.mubr.msk.bf16.mxu1 %vm234_vm6, %v1366_v58  ;;  %v1365_v0 = vadd.f32 %v3162_v51, %v1355_v59 }
 0xb55   :  { %v1367_v2 = vpack.c.bf16 %v1365_v0, %v1364_v62 }
 0xb57   :  { %3480 = vmatmul.mubr.msk.bf16.vlgmr.msra.gmra.mxu1 %vm234_vm6, %v1367_v2 }
 0xc17   :  { %v3481_v10 = vpop.f32.mrf.mxu1 }
 0xc18   :  { %v1437_v30 = vmul.f32 %v3481_v10, %v3481_v10 }
 0xc19   :  { %v1420_v11 = vpop.f32.mrf.mxu1 }
 0xc1a   :  { %v1441_v60 = vmul.f32 %v3481_v10, %v1437_v30  ;;  %v1435_v12 = vmul.f32 %v1420_v11, %v1420_v11 }
 0xc1b   :  { %v3482_v14 = vpop.f32.mrf.mxu1 }
 0xc1c   :  { %v1445_v15 = vmul.f32 0.044715, %v1441_v60  ;;  %v1439_v17 = vmul.f32 %v1435_v12, %v1420_v11  ;;  %v1438_v18 = vmul.f32 %v3482_v14, %v3482_v14 }
 0xc1d   :  { %v1423_v19 = vpop.f32.mrf.mxu1 }
 0xc1e   :  { %v1449_v20 = vadd.f32 %v3481_v10, %v1445_v15  ;;  %v1443_v21 = vmul.f32 0.044715, %v1439_v17  ;;  %v1442_v22 = vmul.f32 %v3482_v14, %v1438_v18  ;;  %v1436_v24 = vmul.f32 %v1423_v19, %v1423_v19 }
 0xc20   :  { %v1453_v26 = vmul.f32 0.7978846, %v1449_v20  ;;  %v1447_v27 = vadd.f32 %v1443_v21, %v1420_v11  ;;  %v1446_v61 = vmul.f32 0.044715, %v1442_v22  ;;  %v1440_v33 = vmul.f32 %v1436_v24, %v1423_v19  ;;  %v3644_v22 = vld [vmem:[%s4474_s3 + $0x18] sm:$0xff]   ;;  %v3645_v24 = vld [vmem:[%s4474_s3 + $0x10] sm:$0xff]  }
 0xc21   :  { %3503 = vmatprep.subr.bf16.mxu1 %v3644_v22 }
 0xc22   :  { %v1451_v31 = vmul.f32 0.7978846, %v1447_v27  ;;  %v1450_v34 = vadd.f32 %v3482_v14, %v1446_v61  ;;  %v1444_v35 = vmul.f32 0.044715, %v1440_v33  ;;  %3708 = vtanh.f32 %v1453_v26  ;;  %3504 = vmatpush3.bf16.msra.mxu1 %v3644_v22 }
 0xc23   :  { %3505 = vmatprep.subr.bf16.mxu1 %v3645_v24 }
 0xc24   :  { %3710 = vtanh.f32 %v1451_v31  ;;  %v1454_v36 = vmul.f32 0.7978846, %v1450_v34  ;;  %v1448_v37 = vadd.f32 %v1444_v35, %v1423_v19 }
 0xc26   :  { %3712 = vtanh.f32 %v1454_v36  ;;  %v1452_v38 = vmul.f32 0.7978846, %v1448_v37  ;;  %3506 = vmatpush3.bf16.msra.mxu1 %v3645_v24 }
 0xc28   :  { %3714 = vtanh.f32 %v1452_v38 }
 0xc2f   :  { %v3709_v39 = vpop.eup %3708 }
 0xc30   :  { %v1461_v43 = vadd.f32 1.0, %v3709_v39 }
 0xc31   :  { %v3711_v40 = vpop.eup %3710 }
 0xc32   :  { %v1459_v8 = vadd.f32 1.0, %v3711_v40  ;;  %v1465_v48 = vmul.f32 0.5, %v1461_v43 }
 0xc33   :  { %v3713_v42 = vpop.eup %3712 }
 0xc34   :  { %v1462_v45 = vadd.f32 1.0, %v3713_v42  ;;  %v1463_v47 = vmul.f32 0.5, %v1459_v8  ;;  %v1469_v52 = vmul.f32 %v3481_v10, %v1465_v48  ;;  %v3205_v42 = vld [vmem:[%s4475_s7 + $0x1] ss:$0 sm:$0xff] }
 0xc35   :  { %v3715_v46 = vpop.eup %3714 }
 0xc36   :  { %v1466_v13 = vmul.f32 0.5, %v1462_v45  ;;  %v1460_v5 = vadd.f32 1.0, %v3715_v46  ;;  %v1467_v50 = vmul.f32 %v1463_v47, %v1420_v11  ;;  %v3206_v45 = vld [vmem:[%s4476_s8 + $0x1] ss:$0 sm:$0xff] }
 0xc38   :  { %v1464_v16 = vmul.f32 0.5, %v1460_v5  ;;  %v1470_v49 = vmul.f32 %v3482_v14, %v1466_v13 }
 0xc3a   :  { %v1468_v51 = vmul.f32 %v1464_v16, %v1423_v19  ;;  %v1472_v54 = vpack.c.bf16 %v1470_v49, %v1469_v52 }
 0xc3c   :  { %v1471_v53 = vpack.c.bf16 %v1468_v51, %v1467_v50 }
 0xc3e   :  { %3499 = vmatprep.mubr.bf16.mxu0 %v1471_v53 }
 0xc3f   :  { %3500 = vmatmul.mubr.bf16.vlgmr.msra.gmra.mxu0 %v1472_v54 }
 0xcff   :  { %v3501_v55 = vpop.f32.mrf.mxu0 }
 0xd00   :  { %v4173_v59 = vadd.f32 %v3501_v55, %v4107_v1 }
 0xd01   :  { %v1555_v56 = vpop.f32.mrf.mxu0 }
 0xd02   :  { %v4170_v57 = vadd.f32 %v1555_v56, %v4104_v63  ;;  %v1616_v28 = vsel %vm234_vm6, %v4173_v59, 0.0 }
 0xd03   :  { %v3502_v58 = vpop.f32.mrf.mxu0 }
 0xd04   :  { %v1610_v62 = vsel %vm234_vm6, %v4170_v57, 0.0  ;;  %v4181_v3 = vadd.f32 %v3502_v58, %v4115_v6 }
 0xd05   :  { %1611 = vadd.xlane.f32.xlu1 %v1610_v62  ;;  %v1558_v0 = vpop.f32.mrf.mxu0 }
 0xd06   :  { %v4178_v2 = vadd.f32 %v1558_v0, %v4112_v4  ;;  %v1619_v1 = vsel %vm234_vm6, %v4181_v3, 0.0 }
 0xd08   :  { %v1613_v63 = vsel %vm234_vm6, %v4178_v2, 0.0 }
 0xd09   :  { %1617 = vadd.xlane.f32.xlu1 %v1616_v28  ;;  %1614 = vadd.xlane.f32.xlu0 %v1613_v63 }
 0xd0d   :  { %1620 = vadd.xlane.f32.xlu0 %v1619_v1 }
 0xd8e   :  { %v1612_v23 = vpop.xlane.xlu1 %1611 }
 0xd8f   :  { %v1622_v25 = vmul.f32 0.03125, %v1612_v23 }
 0xd91   :  { %v1626_v4 = vsub.f32 %v4170_v57, %v1622_v25 }
 0xd92   :  { %v1618_v7 = vpop.xlane.xlu1 %1617  ;;  %v1615_v9 = vpop.xlane.xlu0 %1614 }
 0xd93   :  { %v1624_v6 = vmul.f32 0.03125, %v1618_v7  ;;  %v1623_v29 = vmul.f32 0.03125, %v1615_v9  ;;  %v1630_v32 = vmul.f32 %v1626_v4, %v1626_v4 }
 0xd95   :  { %v1628_v10 = vsub.f32 %v4173_v59, %v1624_v6  ;;  %v1627_v30 = vsub.f32 %v4178_v2, %v1623_v29  ;;  %v1634_v11 = vsel %vm234_vm6, %v1630_v32, 0.0 }
 0xd96   :  { %1635 = vadd.xlane.f32.xlu1 %v1634_v11  ;;  %v1621_v60 = vpop.xlane.xlu0 %1620 }
 0xd97   :  { %v1625_v12 = vmul.f32 0.03125, %v1621_v60  ;;  %v1632_v14 = vmul.f32 %v1628_v10, %v1628_v10  ;;  %v1631_v15 = vmul.f32 %v1627_v30, %v1627_v30 }
 0xd99   :  { %v1629_v17 = vsub.f32 %v4181_v3, %v1625_v12  ;;  %v1640_v18 = vsel %vm234_vm6, %v1632_v14, 0.0  ;;  %v1637_v19 = vsel %vm234_vm6, %v1631_v15, 0.0 }
 0xd9a   :  { %1641 = vadd.xlane.f32.xlu1 %v1640_v18  ;;  %1638 = vadd.xlane.f32.xlu0 %v1637_v19 }
 0xd9b   :  { %v1633_v20 = vmul.f32 %v1629_v17, %v1629_v17 }
 0xd9d   :  { %v1643_v21 = vsel %vm234_vm6, %v1633_v20, 0.0 }
 0xd9e   :  { %1644 = vadd.xlane.f32.xlu0 %v1643_v21 }
 0xe1f   :  { %v1636_v26 = vpop.xlane.xlu1 %1635 }
 0xe20   :  { %v1646_v27 = vmul.f32 0.03125, %v1636_v26 }
 0xe22   :  { %v1650_v61 = vadd.f32 1e-05, %v1646_v27 }
 0xe23   :  { %v1642_v33 = vpop.xlane.xlu1 %1641  ;;  %v1639_v31 = vpop.xlane.xlu0 %1638 }
 0xe24   :  { %3716 = vrsqrt.f32 %v1650_v61  ;;  %v1648_v34 = vmul.f32 0.03125, %v1642_v33  ;;  %v1647_v35 = vmul.f32 0.03125, %v1639_v31 }
 0xe26   :  { %v1652_v36 = vadd.f32 1e-05, %v1648_v34  ;;  %v1651_v37 = vadd.f32 1e-05, %v1647_v35 }
 0xe27   :  { %v1645_v38 = vpop.xlane.xlu0 %1644 }
 0xe28   :  { %3718 = vrsqrt.f32 %v1652_v36  ;;  %v1649_v39 = vmul.f32 0.03125, %v1645_v38 }
 0xe29   :  { %3720 = vrsqrt.f32 %v1651_v37 }
 0xe2a   :  { %v1653_v40 = vadd.f32 1e-05, %v1649_v39 }
 0xe2c   :  { %3722 = vrsqrt.f32 %v1653_v40 }
 0xe31   :  { %v3717_v8 = vpop.eup %3716 }
 0xe32   :  { %v1658_v43 = vmul.f32 %v3717_v8, %v1626_v4 }
 0xe34   :  { %v1668_v46 = vmul.f32 %v3205_v42, %v1658_v43 }
 0xe35   :  { %v3719_v47 = vpop.eup %3718 }
 0xe36   :  { %v3721_v13 = vpop.eup %3720  ;;  %v1660_v5 = vmul.f32 %v3719_v47, %v1628_v10  ;;  %v1678_v48 = vadd.f32 %v3206_v45, %v1668_v46 }
 0xe37   :  { %v1659_v16 = vmul.f32 %v3721_v13, %v1627_v30 }
 0xe38   :  { %v1670_v49 = vmul.f32 %v3205_v42, %v1660_v5 }
 0xe39   :  { %v3723_v50 = vpop.eup %3722  ;;  %v1669_v51 = vmul.f32 %v3205_v42, %v1659_v16 }
 0xe3a   :  { %v1661_v52 = vmul.f32 %v3723_v50, %v1629_v17  ;;  %v1680_v53 = vadd.f32 %v3206_v45, %v1670_v49 }
 0xe3b   :  { %v1679_v54 = vadd.f32 %v3206_v45, %v1669_v51 }
 0xe3c   :  { %v1671_v55 = vmul.f32 %v3205_v42, %v1661_v52 }
 0xe3d   :  { %v1682_v56 = vpack.c.bf16 %v1679_v54, %v1678_v48 }
 0xe3e   :  { %v1681_v58 = vadd.f32 %v3206_v45, %v1671_v55 }
 0xe3f   :  { %3507 = vmatprep.mubr.msk.bf16.mxu1 %vm234_vm6, %v1682_v56 }
 0xe40   :  { %v1683_v62 = vpack.c.bf16 %v1681_v58, %v1680_v53 }
 0xe42   :  { %3508 = vmatmul.mubr.msk.bf16.vlgmr.msra.gmra.mxu1 %vm234_vm6, %v1683_v62 }
 0xf02   :  { %v4211_v0 = vpop.f32.mrf.mxu1 }
 0xf03   :  { %3543 = vmatprep.mubr.msk.f32.mxu0 %vm383_vm7, %v4211_v0 }
 0xf04   :  { %v4215_v28 = vpop.f32.mrf.mxu1 }
 0xf05   :  { %1753 = vrot.lane.b32.xlu0 %v4215_v28, %s3782_s20  ;;  %3515 = vmatprep.mubr.msk.f32.mxu1 %vm383_vm7, %v4215_v28 }
 0xf06   :  { %v4221_v63 = vpop.f32.mrf.mxu1 }
 0xf08   :  { %v1739_v1 = vpop.f32.mrf.mxu1 }
 0xf09   :  { %1755 = vrot.lane.b32.xlu1 %v1739_v1, %s3782_s20 }
 0xf0d   :  { %1864 = vrot.lane.b32.xlu1 %v1739_v1, %s3783_s21 }
 0xf11   :  { %1961 = vrot.lane.b32.xlu1 %v1739_v1, %s3784_s22 }
 0xf15   :  { %1959 = vrot.lane.b32.xlu1 %v4215_v28, %s3784_s22 }
 0xf77   :  { %v1754_v25 = vpop.permute.xlu0 %1753 }
 0xf7b   :  { %v1756_v23 = vpop.permute.xlu1 %1755 }
 0xf7c   :  { %3511 = vmatprep.subr.msk.mxu1 %vm383_vm7, %v1756_v23 }
 0xf7d   :  { %3512 = vmatpush3.xpose.msk.msra.mxu1 %vm383_vm7, %v1756_v23 }
 0xf7e   :  { %3513 = vmatprep.subr.msk.mxu1 %vm383_vm7, %v1754_v25 }
 0xf7f   :  { %v1865_v4 = vpop.permute.xlu1 %1864 }
 0xf81   :  { %3514 = vmatpush3.xpose.msk.msra.mxu1 %vm383_vm7, %v1754_v25 }
 0xf82   :  { %3518 = vmatprep.subr.mxu1 %v1865_v4 }
 0xf83   :  { %v1962_v60 = vpop.permute.xlu1 %1961 }
 0xf84   :  { %3516 = vmatmul.mubr.msk.f32.vlgmr.msra.gmra.mxu1 %vm383_vm7, %v1739_v1 }
 0xf85   :  { %3519 = vmatpush3.msra.mxu1 %v1865_v4 }
 0xf87   :  { %v1960_v12 = vpop.permute.xlu1 %1959 }
0x1044   :  { %v3517_v7 = vpop.f32.mrf.mxu1 }
0x1045   :  { %v1841_v9 = vmul.f32 0.25, %v3517_v7 }
0x1046   :  { %v1831_v6 = vpop.f32.mrf.mxu1 }
0x1047   :  { %v1840_v29 = vmul.f32 0.25, %v1831_v6  ;;  %v1843_v32 = vadd.f32 %v1841_v9, %v3981_v41 }
0x1049   :  { %v1847_v10 = vsel %vm383_vm7, %v1843_v32, -inf  ;;  %v1842_v30 = vadd.f32 %v1840_v29, %v3983_v44 }
0x104a   :  { %1848 = vmax.xlane.f32.xlu0 %v1847_v10 }
0x104b   :  { %v1844_v11 = vsel %vm383_vm7, %v1842_v30, -inf }
0x104c   :  { %1845 = vmax.xlane.f32.xlu1 %v1844_v11 }
0x105d   :  { %1955 = vrot.lane.b32.xlu1 %v4215_v28, %s3786_s23 }
0x1060   :  { %1862 = vrot.lane.b32.xlu0 %v4215_v28, %s3783_s21 }
0x1061   :  { %2171 = vrot.lane.b32.xlu1 %v4211_v0, %s3782_s20 }
0x1064   :  { %2173 = vrot.lane.b32.xlu0 %v4221_v63, %s3782_s20 }
0x1065   :  { %2070 = vrot.lane.b32.xlu1 %v1739_v1, %s3787_s24 }
0x1068   :  { %1957 = vrot.lane.b32.xlu0 %v1739_v1, %s3786_s23 }
0x10d3   :  { %v1849_v14 = vpop.xlane.xlu0 %1848 }
0x10d4   :  { %v1851_v15 = vsub.f32 %v1843_v32, %v1849_v14 }
0x10d5   :  { %v1846_v17 = vpop.xlane.xlu1 %1845 }
0x10d6   :  { %v1850_v18 = vsub.f32 %v1842_v30, %v1846_v17  ;;  %v1854_v19 = vmul.f32 1.442695, %v1851_v15 }
0x10d7   :  { %v1863_v20 = vpop.permute.xlu0 %1862 }
0x10d8   :  { %v1852_v21 = vmul.f32 1.442695, %v1850_v18  ;;  %3520 = vmatprep.subr.mxu1 %v1863_v20 }
0x10d9   :  { %3521 = vmatpush3.msra.mxu1 %v1863_v20  ;;  %v1956_v22 = vpop.permute.xlu1 %1955 }
0x10da   :  { %3724 = vpow2.f32 %v1852_v21  ;;  %3525 = vmatprep.subr.msk.mxu1 %vm383_vm7, %v1962_v60 }
0x10db   :  { %3726 = vpow2.f32 %v1854_v19  ;;  %v2174_v24 = vpop.permute.xlu0 %2173 }
0x10dc   :  { %3539 = vmatprep.subr.msk.mxu0 %vm383_vm7, %v2174_v24 }
0x10dd   :  { %3540 = vmatpush3.xpose.msk.msra.mxu0 %vm383_vm7, %v2174_v24  ;;  %v2172_v26 = vpop.permute.xlu1 %2171 }
0x10de   :  { %3541 = vmatprep.subr.msk.mxu0 %vm383_vm7, %v2172_v26 }
0x10df   :  { %v1958_v31 = vpop.permute.xlu0 %1957 }
0x10e1   :  { %3542 = vmatpush3.xpose.msk.msra.mxu0 %vm383_vm7, %v2172_v26  ;;  %v2071_v33 = vpop.permute.xlu1 %2070 }
0x10e4   :  { %3544 = vmatmul.mubr.msk.f32.vlgmr.msra.gmra.mxu0 %vm383_vm7, %v4221_v63 }
0x10e7   :  { %v4254_v27 = vpop.eup %3724 }
0x10e8   :  { %v4256_v61 = vpop.eup %3726  ;;  %3522 = vmatprep.mubr.msk.f32.mxu1 %vm383_vm7, %v4254_v27 }
0x10e9   :  { %3523 = vmatmul.mubr.msk.f32.vlgmr.msra.gmra.mxu1 %vm383_vm7, %v4256_v61 }
0x10ea   :  { %3526 = vmatpush3.xpose.msk.msra.mxu1 %vm383_vm7, %v1962_v60  ;;  %3529 = vmatprep.mubr.msk.f32.mxu1 %vm383_vm7, %v1956_v22 }
0x10eb   :  { %3527 = vmatprep.subr.msk.mxu1 %vm383_vm7, %v1960_v12 }
0x10ee   :  { %3528 = vmatpush3.xpose.msk.msra.mxu1 %vm383_vm7, %v1960_v12 }
0x10ef   :  { %3532 = vmatprep.subr.mxu1 %v2071_v33 }
0x10f1   :  { %3530 = vmatmul.mubr.msk.f32.vlgmr.msra.gmra.mxu1 %vm383_vm7, %v1958_v31 }
0x10f2   :  { %3533 = vmatpush3.msra.mxu1 %v2071_v33 }
0x11a4   :  { %v3545_v34 = vpop.f32.mrf.mxu0 }
0x11a5   :  { %v2259_v36 = vmul.f32 0.25, %v3545_v34 }
0x11a6   :  { %v2249_v35 = vpop.f32.mrf.mxu0 }
0x11a7   :  { %v2258_v37 = vmul.f32 0.25, %v2249_v35  ;;  %v2261_v8 = vadd.f32 %v2259_v36, %v3981_v41 }
0x11a9   :  { %v2260_v38 = vadd.f32 %v2258_v37, %v3983_v44  ;;  %v4268_v39 = vpop.f32.mrf.mxu1  ;;  %v2265_v43 = vsel %vm383_vm7, %v2261_v8, -inf }
0x11ab   :  { %v2262_v40 = vsel %vm383_vm7, %v2260_v38, -inf  ;;  %v4272_v42 = vpop.f32.mrf.mxu1 }
0x11ac   :  { %2263 = vmax.xlane.f32.xlu0 %v2262_v40 }
0x11b0   :  { %2266 = vmax.xlane.f32.xlu0 %v2265_v43 }
0x11b1   :  { %v3531_v45 = vpop.f32.mrf.mxu1 }
0x11b2   :  { %v2047_v46 = vmul.f32 0.25, %v3531_v45 }
0x11b3   :  { %v2037_v47 = vpop.f32.mrf.mxu1 }
0x11b4   :  { %v2046_v13 = vmul.f32 0.25, %v2037_v47  ;;  %v2049_v5 = vadd.f32 %v2047_v46, %v3981_v41  ;;  %v1859_v47 = vsel %vm383_vm7, %v4256_v61, 0.0 }
0x11b6   :  { %v2053_v48 = vsel %vm383_vm7, %v2049_v5, -inf  ;;  %v2048_v16 = vadd.f32 %v2046_v13, %v3983_v44 }
0x11b7   :  { %2054 = vmax.xlane.f32.xlu1 %v2053_v48 }
0x11b8   :  { %v2050_v49 = vsel %vm383_vm7, %v2048_v16, -inf }
0x11b9   :  { %2051 = vmax.xlane.f32.xlu0 %v2050_v49 }
0x11c8   :  { %2282 = vrot.lane.b32.xlu1 %v4221_v63, %s3783_s21 }
0x11cc   :  { %2280 = vrot.lane.b32.xlu1 %v4211_v0, %s3783_s21 }
0x11cf   :  { %2068 = vrot.lane.b32.xlu0 %v4215_v28, %s3787_s24 }
0x11d0   :  { %2377 = vrot.lane.b32.xlu1 %v4211_v0, %s3784_s22 }
0x11d3   :  { %2379 = vrot.lane.b32.xlu0 %v4221_v63, %s3784_s22 }
0x11d4   :  { %2375 = vrot.lane.b32.xlu1 %v4221_v63, %s3786_s23 }
0x11d7   :  { %2373 = vrot.lane.b32.xlu0 %v4211_v0, %s3786_s23 }
0x1235   :  { %v2264_v50 = vpop.xlane.xlu0 %2263 }
0x1236   :  { %v2268_v53 = vsub.f32 %v2260_v38, %v2264_v50 }
0x1238   :  { %v2270_v28 = vmul.f32 1.442695, %v2268_v53 }
0x1239   :  { %v2267_v51 = vpop.xlane.xlu0 %2266 }
0x123a   :  { %v2269_v58 = vsub.f32 %v2261_v8, %v2267_v51 }
0x123c   :  { %v2272_v25 = vmul.f32 1.442695, %v2269_v58 }
0x1240   :  { %v2055_v52 = vpop.xlane.xlu1 %2054 }
0x1241   :  { %v2057_v54 = vsub.f32 %v2049_v5, %v2055_v52 }
0x1242   :  { %v2052_v55 = vpop.xlane.xlu0 %2051 }
0x1243   :  { %v2056_v56 = vsub.f32 %v2048_v16, %v2052_v55  ;;  %v2060_v62 = vmul.f32 1.442695, %v2057_v54 }
0x1244   :  { %v2283_v4 = vpop.permute.xlu1 %2282 }
0x1245   :  { %v2058_v1 = vmul.f32 1.442695, %v2056_v56 }
0x1246   :  { %v2069_v23 = vpop.permute.xlu0 %2068 }
0x1247   :  { %3728 = vpow2.f32 %v2058_v1  ;;  %3534 = vmatprep.subr.mxu1 %v2069_v23 }
0x1248   :  { %3730 = vpow2.f32 %v2060_v62  ;;  %3535 = vmatpush3.msra.mxu1 %v2069_v23  ;;  %v2281_v29 = vpop.permute.xlu1 %2280 }
0x1249   :  { %3732 = vpow2.f32 %v2270_v28  ;;  %3546 = vmatprep.subr.mxu1 %v2283_v4 }
0x124a   :  { %3734 = vpow2.f32 %v2272_v25  ;;  %v2380_v9 = vpop.permute.xlu0 %2379 }
0x124c   :  { %v2378_v11 = vpop.permute.xlu1 %2377 }
0x124e   :  { %v2374_v30 = vpop.permute.xlu0 %2373 }
0x1250   :  { %v2376_v60 = vpop.permute.xlu1 %2375 }
0x1254   :  { %v3729_v7 = vpop.eup %3728 }
0x1255   :  { %v3731_v6 = vpop.eup %3730  ;;  %3536 = vmatprep.mubr.msk.f32.mxu1 %vm383_vm7, %v3729_v7  ;;  %v2062_v34 = vsel %vm383_vm7, %v3729_v7, 0.0 }
0x1256   :  { %v3733_v32 = vpop.eup %3732  ;;  %3537 = vmatmul.mubr.msk.f32.vlgmr.msra.gmra.mxu1 %vm383_vm7, %v3731_v6  ;;  %v2065_v31 = vsel %vm383_vm7, %v3731_v6, 0.0 }
0x1257   :  { %3547 = vmatpush3.msra.mxu1 %v2283_v4  ;;  %3550 = vmatprep.mubr.msk.f32.mxu1 %vm383_vm7, %v3733_v32  ;;  %v3735_v10 = vpop.eup %3734 }
0x1258   :  { %3548 = vmatprep.subr.mxu1 %v2281_v29  ;;  %v2277_v13 = vsel %vm383_vm7, %v3735_v10, 0.0 }
0x1259   :  { %3549 = vmatpush3.msra.mxu1 %v2281_v29 }
0x125a   :  { %3553 = vmatprep.subr.msk.mxu1 %vm383_vm7, %v2380_v9  ;;  %3551 = vmatmul.mubr.msk.f32.vlgmr.msra.gmra.mxu1 %vm383_vm7, %v3735_v10  ;;  %v3647_v10 = vld [vmem:[%s4477_s4 + $0x10] sm:$0xff]  }
0x125b   :  { %3554 = vmatpush3.xpose.msk.msra.mxu1 %vm383_vm7, %v2380_v9  ;;  %3557 = vmatprep.mubr.msk.f32.mxu1 %vm383_vm7, %v2374_v30 }
0x125c   :  { %3555 = vmatprep.subr.msk.mxu1 %vm383_vm7, %v2378_v11 }
0x125f   :  { %3556 = vmatpush3.xpose.msk.msra.mxu1 %vm383_vm7, %v2378_v11 }
0x1262   :  { %3558 = vmatmul.mubr.msk.f32.vlgmr.msra.gmra.mxu1 %vm383_vm7, %v2376_v60 }
0x1316   :  { %v3538_v12 = vpop.f32.mrf.mxu1 }
0x1318   :  { %v2146_v14 = vpop.f32.mrf.mxu1 }
0x131a   :  { %v4303_v15 = vpop.f32.mrf.mxu1 }
0x131c   :  { %v4305_v17 = vpop.f32.mrf.mxu1 }
0x1322   :  { %v3559_v18 = vpop.f32.mrf.mxu1 }
0x1323   :  { %v2465_v19 = vmul.f32 0.25, %v3559_v18 }
0x1324   :  { %v2455_v20 = vpop.f32.mrf.mxu1 }
0x1325   :  { %v2464_v21 = vmul.f32 0.25, %v2455_v20  ;;  %v2467_v22 = vadd.f32 %v2465_v19, %v3981_v41  ;;  %v1856_v41 = vsel %vm383_vm7, %v4254_v27, 0.0 }
0x1327   :  { %v2471_v24 = vsel %vm383_vm7, %v2467_v22, -inf  ;;  %v2466_v26 = vadd.f32 %v2464_v21, %v3983_v44  ;;  %v2274_v44 = vsel %vm383_vm7, %v3733_v32, 0.0 }
0x1328   :  { %2472 = vmax.xlane.f32.xlu1 %v2471_v24 }
0x1329   :  { %v2468_v33 = vsel %vm383_vm7, %v2466_v26, -inf }
0x132a   :  { %2469 = vmax.xlane.f32.xlu0 %v2468_v33 }
0x1339   :  { %2486 = vrot.lane.b32.xlu1 %v4211_v0, %s3787_s24 }
0x1340   :  { %2488 = vrot.lane.b32.xlu0 %v4221_v63, %s3787_s24 }
0x135d   :  { %2066 = vadd.xlane.f32.xlu1 %v2065_v31 }
0x135f   :  { %2063 = vadd.xlane.f32.xlu0 %v2062_v34 }
0x1361   :  { %1857 = vadd.xlane.f32.xlu1 %v1856_v41 }
0x1365   :  { %2275 = vadd.xlane.f32.xlu1 %v2274_v44 }
0x13b1   :  { %v2473_v35 = vpop.xlane.xlu1 %2472 }
0x13b2   :  { %v2475_v36 = vsub.f32 %v2467_v22, %v2473_v35 }
0x13b3   :  { %v2470_v37 = vpop.xlane.xlu0 %2469 }
0x13b4   :  { %v2474_v0 = vsub.f32 %v2466_v26, %v2470_v37  ;;  %v2478_v38 = vmul.f32 1.442695, %v2475_v36 }
0x13b5   :  { %v2487_v8 = vpop.permute.xlu1 %2486 }
0x13b6   :  { %v2476_v40 = vmul.f32 1.442695, %v2474_v0 }
0x13b7   :  { %v2489_v63 = vpop.permute.xlu0 %2488 }
0x13b8   :  { %3736 = vpow2.f32 %v2476_v40  ;;  %3560 = vmatprep.subr.mxu0 %v2489_v63 }
0x13b9   :  { %3738 = vpow2.f32 %v2478_v38  ;;  %3561 = vmatpush3.msra.mxu0 %v2489_v63 }
0x13ba   :  { %3562 = vmatprep.subr.mxu0 %v2487_v8 }
0x13bb   :  { %3563 = vmatpush3.msra.mxu0 %v2487_v8 }
0x13c5   :  { %v3737_v43 = vpop.eup %3736 }
0x13c6   :  { %v3739_v27 = vpop.eup %3738  ;;  %3564 = vmatprep.mubr.msk.f32.mxu0 %vm383_vm7, %v3737_v43  ;;  %v2480_v45 = vsel %vm383_vm7, %v3737_v43, 0.0 }
0x13c7   :  { %2481 = vadd.xlane.f32.xlu0 %v2480_v45  ;;  %3565 = vmatmul.mubr.msk.f32.vlgmr.msra.gmra.mxu0 %vm383_vm7, %v3739_v27  ;;  %v2483_v46 = vsel %vm383_vm7, %v3739_v27, 0.0 }
0x13cb   :  { %2484 = vadd.xlane.f32.xlu0 %v2483_v46 }
0x13cf   :  { %1860 = vadd.xlane.f32.xlu0 %v1859_v47 }
0x13d3   :  { %2278 = vadd.xlane.f32.xlu0 %v2277_v13 }
0x13e6   :  { %v2067_v5 = vpop.xlane.xlu1 %2066 }
0x13e7   :  { %3740 = vrcp.f32 %v2067_v5 }
0x13e8   :  { %v2064_v48 = vpop.xlane.xlu0 %2063 }
0x13e9   :  { %3742 = vrcp.f32 %v2064_v48 }
0x13ea   :  { %v1858_v16 = vpop.xlane.xlu1 %1857 }
0x13eb   :  { %3744 = vrcp.f32 %v1858_v16 }
0x13ee   :  { %v2276_v49 = vpop.xlane.xlu1 %2275 }
0x13ef   :  { %3746 = vrcp.f32 %v2276_v49 }
0x13f4   :  { %v3741_v50 = vpop.eup %3740 }
0x13f5   :  { %v2158_v51 = vmul.f32 %v3741_v50, %v3538_v12 }
0x13f6   :  { %v3743_v52 = vpop.eup %3742 }
0x13f7   :  { %2163 = vrot.lane.b32.xlu0 %v2158_v51, %s3788_s25  ;;  %v2157_v53 = vmul.f32 %v3743_v52, %v2146_v14  ;;  %v3648_v52 = vld [vmem:[%s4478_s5 + $0x18] sm:$0xff]  }
0x13f8   :  { %v3745_v54 = vpop.eup %3744  ;;  %3575 = vmatprep.subr.bf16.mxu1 %v3648_v52 }
0x13f9   :  { %2161 = vrot.lane.b32.xlu1 %v2157_v53, %s3788_s25  ;;  %v1951_v61 = vmul.f32 %v3745_v54, %v4272_v42  ;;  %v3649_v53 = vld [vmem:[%s4478_s5 + $0x10] sm:$0xff]   ;;  %3576 = vmatpush3.bf16.msra.mxu1 %v3648_v52 }
0x13fa   :  { %3577 = vmatprep.subr.bf16.mxu1 %v3649_v53 }
0x13fb   :  { %1953 = vst.msk [vmem:[#allocation2] sm:$0xff] %vm383_vm7, %v1951_v61 }
0x13fc   :  { %v3747_v55 = vpop.eup %3746 }
0x13fd   :  { %v2369_v56 = vmul.f32 %v3747_v55, %v4305_v17  ;;  %3578 = vmatpush3.bf16.msra.mxu1 %v3649_v53 }
0x13ff   :  { %2371 = vst.msk [vmem:[#allocation2 + $0x10] sm:$0xff] %vm383_vm7, %v2369_v56 }
0x1450   :  { %v2482_v58 = vpop.xlane.xlu0 %2481 }
0x1454   :  { %v2485_v62 = vpop.xlane.xlu0 %2484 }
0x1458   :  { %v1861_v28 = vpop.xlane.xlu0 %1860 }
0x1459   :  { %3748 = vrcp.f32 %v1861_v28 }
0x145c   :  { %v2279_v1 = vpop.xlane.xlu0 %2278 }
0x145d   :  { %3750 = vrcp.f32 %v2279_v1 }
0x145e   :  { %3752 = vrcp.f32 %v2482_v58 }
0x145f   :  { %3754 = vrcp.f32 %v2485_v62 }
0x1466   :  { %v3749_v23 = vpop.eup %3748 }
0x1467   :  { %v1952_v25 = vmul.f32 %v3749_v23, %v4268_v39  ;;  %v3646_v39 = vld [vmem:[%s4477_s4 + $0x18] sm:$0xff]  }
0x1468   :  { %3567 = vmatprep.subr.bf16.mxu0 %v3646_v39 }
0x1469   :  { %1954 = vst.msk [vmem:[#allocation2 + $0x8] sm:$0xff] %vm383_vm7, %v1952_v25  ;;  %v2164_v4 = vpop.permute.xlu0 %2163  ;;  %3568 = vmatpush3.bf16.msra.mxu0 %v3646_v39 }
0x146a   :  { %v3751_v42 = vpop.eup %3750  ;;  %2168 = vst.msk [vmem:[#allocation2 + $0x8] sm:$0xff] %vm794_vm10, %v2164_v4  ;;  %3569 = vmatprep.subr.bf16.mxu0 %v3647_v10 }
0x146b   :  { %v2162_v7 = vpop.permute.xlu1 %2161  ;;  %v2370_v9 = vmul.f32 %v3751_v42, %v4303_v15  ;;  %v3753_v11 = vpop.eup %3752 }
0x146c   :  { %2167 = vst.msk [vmem:[#allocation2] sm:$0xff] %vm794_vm10, %v2162_v7  ;;  %v3755_v14 = vpop.eup %3754 }
0x146d   :  { %2372 = vst.msk [vmem:[#allocation2 + $0x18] sm:$0xff] %vm383_vm7, %v2370_v9  ;;  %3570 = vmatpush3.bf16.msra.mxu0 %v3647_v10 }
0x1471   :  { %v2588_v29 = vld [vmem:[#allocation2 + $0x8] sm:$0xff] }
0x1473   :  { %v2587_v6 = vld [vmem:[#allocation2] sm:$0xff] }
0x1474   :  { %v2591_v32 = vpack.c.bf16 %v2588_v29, %v2587_v6  ;;  %v3241_v6 = vld [vmem:[%s4479_s9 + $0x1] ss:$0 sm:$0xff] }
0x1476   :  { %3571 = vmatprep.mubr.msk.bf16.mxu0 %vm234_vm6, %v2591_v32 }
0x1487   :  { %v3566_v30 = vpop.f32.mrf.mxu0 }
0x1488   :  { %v2576_v15 = vmul.f32 %v3755_v14, %v3566_v30 }
0x1489   :  { %v2564_v60 = vpop.f32.mrf.mxu0 }
0x148a   :  { %v2575_v12 = vmul.f32 %v3753_v11, %v2564_v60  ;;  %v3242_v11 = vld [vmem:[%s4480_s10 + $0x1] ss:$0 sm:$0xff] }
0x148c   :  { %2579 = vrot.lane.b32.xlu1 %v2575_v12, %s3788_s25 }
0x1490   :  { %2581 = vrot.lane.b32.xlu1 %v2576_v15, %s3788_s25 }
0x14fe   :  { %v2580_v17 = vpop.permute.xlu1 %2579 }
0x14ff   :  { %2585 = vst.msk [vmem:[#allocation2 + $0x10] sm:$0xff] %vm794_vm10, %v2580_v17 }
0x1502   :  { %v2582_v18 = vpop.permute.xlu1 %2581 }
0x1503   :  { %2586 = vst.msk [vmem:[#allocation2 + $0x18] sm:$0xff] %vm794_vm10, %v2582_v18 }
0x1506   :  { %v2589_v19 = vld [vmem:[#allocation2 + $0x10] sm:$0xff] }
0x150a   :  { %v2590_v20 = vld [vmem:[#allocation2 + $0x18] sm:$0xff] }
0x150b   :  { %v2592_v21 = vpack.c.bf16 %v2590_v20, %v2589_v19 }
0x150d   :  { %3572 = vmatmul.mubr.msk.bf16.vlgmr.msra.gmra.mxu0 %vm234_vm6, %v2592_v21 }
0x15cd   :  { %v3573_v22 = vpop.f32.mrf.mxu0 }
0x15ce   :  { %v4355_v31 = vadd.f32 %v3573_v22, %v4173_v59 }
0x15cf   :  { %v2645_v24 = vpop.f32.mrf.mxu0 }
0x15d0   :  { %v4352_v26 = vadd.f32 %v2645_v24, %v4170_v57  ;;  %v2674_v36 = vsel %vm234_vm6, %v4355_v31, 0.0 }
0x15d1   :  { %v3574_v33 = vpop.f32.mrf.mxu0 }
0x15d2   :  { %v2668_v34 = vsel %vm234_vm6, %v4352_v26, 0.0  ;;  %v4363_v35 = vadd.f32 %v3574_v33, %v4181_v3  ;;  %v3650_v33 = vld [vmem:[%s4481_s6 + $0x78] sm:$0xff]  }
0x15d3   :  { %2669 = vadd.xlane.f32.xlu0 %v2668_v34  ;;  %v2648_v41 = vpop.f32.mrf.mxu0  ;;  %3583 = vmatprep.subr.bf16.mxu0 %v3650_v33  ;;  %v3651_v34 = vld [vmem:[%s4481_s6 + $0x70] sm:$0xff]  }
0x15d4   :  { %v4360_v44 = vadd.f32 %v2648_v41, %v4178_v2  ;;  %v2677_v59 = vsel %vm234_vm6, %v4363_v35, 0.0  ;;  %3584 = vmatpush3.bf16.msra.mxu0 %v3650_v33  ;;  %v3652_v41 = vld [vmem:[%s4481_s6 + $0x68] sm:$0xff]  }
0x15d5   :  { %3585 = vmatprep.subr.bf16.mxu0 %v3651_v34 }
0x15d6   :  { %v2671_v57 = vsel %vm234_vm6, %v4360_v44, 0.0 }
0x15d7   :  { %2675 = vadd.xlane.f32.xlu0 %v2674_v36  ;;  %2672 = vadd.xlane.f32.xlu1 %v2671_v57  ;;  %v3653_v36 = vld [vmem:[%s4481_s6 + $0x60] sm:$0xff]   ;;  %v3654_v57 = vld [vmem:[%s4481_s6 + $0x58] sm:$0xff]  }
0x15d8   :  { %3586 = vmatpush3.bf16.msra.mxu0 %v3651_v34 }
0x15d9   :  { %3587 = vmatprep.subr.bf16.mxu0 %v3652_v41 }
0x15db   :  { %2678 = vadd.xlane.f32.xlu0 %v2677_v59  ;;  %v3655_v59 = vld [vmem:[%s4481_s6 + $0x50] sm:$0xff]  }
0x15dc   :  { %3588 = vmatpush3.bf16.msra.mxu0 %v3652_v41 }
0x15dd   :  { %3589 = vmatprep.subr.bf16.mxu0 %v3653_v36 }
0x15e0   :  { %3590 = vmatpush3.bf16.msra.mxu0 %v3653_v36 }
0x15e1   :  { %3591 = vmatprep.subr.bf16.mxu0 %v3654_v57 }
0x15e4   :  { %3592 = vmatpush3.bf16.msra.mxu0 %v3654_v57 }
0x15e5   :  { %3593 = vmatprep.subr.bf16.mxu0 %v3655_v59 }
0x15e8   :  { %3594 = vmatpush3.bf16.msra.mxu0 %v3655_v59 }
0x165c   :  { %v2670_v37 = vpop.xlane.xlu0 %2669 }
0x165d   :  { %v2680_v0 = vmul.f32 0.03125, %v2670_v37  ;;  %v3656_v37 = vld [vmem:[%s4481_s6 + $0x48] sm:$0xff]  }
0x165e   :  { %3595 = vmatprep.subr.bf16.mxu0 %v3656_v37 }
0x165f   :  { %v2684_v2 = vsub.f32 %v4352_v26, %v2680_v0  ;;  %3596 = vmatpush3.bf16.msra.mxu0 %v3656_v37  ;;  %v3657_v0 = vld [vmem:[%s4481_s6 + $0x40] sm:$0xff]  }
0x1660   :  { %v2676_v38 = vpop.xlane.xlu0 %2675  ;;  %v2673_v40 = vpop.xlane.xlu1 %2672  ;;  %3597 = vmatprep.subr.bf16.mxu0 %v3657_v0 }
0x1661   :  { %v2682_v3 = vmul.f32 0.03125, %v2676_v38  ;;  %v2681_v63 = vmul.f32 0.03125, %v2673_v40  ;;  %v2688_v8 = vmul.f32 %v2684_v2, %v2684_v2 }
0x1663   :  { %v2686_v43 = vsub.f32 %v4355_v31, %v2682_v3  ;;  %v2685_v27 = vsub.f32 %v4360_v44, %v2681_v63  ;;  %v2692_v45 = vsel %vm234_vm6, %v2688_v8, 0.0  ;;  %3598 = vmatpush3.bf16.msra.mxu0 %v3657_v0 }
0x1664   :  { %v2679_v46 = vpop.xlane.xlu0 %2678  ;;  %2693 = vadd.xlane.f32.xlu1 %v2692_v45 }
0x1665   :  { %v2683_v47 = vmul.f32 0.03125, %v2679_v46  ;;  %v2690_v13 = vmul.f32 %v2686_v43, %v2686_v43  ;;  %v2689_v5 = vmul.f32 %v2685_v27, %v2685_v27 }
0x1667   :  { %v2687_v48 = vsub.f32 %v4363_v35, %v2683_v47  ;;  %v2698_v16 = vsel %vm234_vm6, %v2690_v13, 0.0  ;;  %v2695_v49 = vsel %vm234_vm6, %v2689_v5, 0.0 }
0x1668   :  { %2699 = vadd.xlane.f32.xlu1 %v2698_v16  ;;  %2696 = vadd.xlane.f32.xlu0 %v2695_v49 }
0x1669   :  { %v2691_v50 = vmul.f32 %v2687_v48, %v2687_v48 }
0x166b   :  { %v2701_v51 = vsel %vm234_vm6, %v2691_v50, 0.0 }
0x166c   :  { %2702 = vadd.xlane.f32.xlu0 %v2701_v51 }
0x16ed   :  { %v2694_v54 = vpop.xlane.xlu1 %2693 }
0x16ee   :  { %v2704_v61 = vmul.f32 0.03125, %v2694_v54 }
0x16f0   :  { %v2708_v55 = vadd.f32 1e-05, %v2704_v61 }
0x16f1   :  { %v2697_v56 = vpop.xlane.xlu0 %2696  ;;  %v2700_v58 = vpop.xlane.xlu1 %2699 }
0x16f2   :  { %3756 = vrsqrt.f32 %v2708_v55  ;;  %v2705_v62 = vmul.f32 0.03125, %v2697_v56  ;;  %v2706_v28 = vmul.f32 0.03125, %v2700_v58 }
0x16f4   :  { %v2709_v1 = vadd.f32 1e-05, %v2705_v62  ;;  %v2710_v23 = vadd.f32 1e-05, %v2706_v28 }
0x16f5   :  { %v2703_v25 = vpop.xlane.xlu0 %2702 }
0x16f6   :  { %3758 = vrsqrt.f32 %v2709_v1  ;;  %v2707_v4 = vmul.f32 0.03125, %v2703_v25 }
0x16f7   :  { %3760 = vrsqrt.f32 %v2710_v23 }
0x16f8   :  { %v2711_v42 = vadd.f32 1e-05, %v2707_v4 }
0x16fa   :  { %3762 = vrsqrt.f32 %v2711_v42 }
0x16ff   :  { %v3757_v7 = vpop.eup %3756 }
0x1700   :  { %v2716_v9 = vmul.f32 %v3757_v7, %v2684_v2 }
0x1702   :  { %v2726_v10 = vmul.f32 %v3241_v6, %v2716_v9 }
0x1703   :  { %v3759_v29 = vpop.eup %3758 }
0x1704   :  { %v3761_v32 = vpop.eup %3760  ;;  %v2717_v39 = vmul.f32 %v3759_v29, %v2685_v27  ;;  %v2736_v15 = vadd.f32 %v3242_v11, %v2726_v10 }
0x1705   :  { %v2718_v30 = vmul.f32 %v3761_v32, %v2686_v43 }
0x1706   :  { %v2727_v60 = vmul.f32 %v3241_v6, %v2717_v39 }
0x1707   :  { %v3763_v12 = vpop.eup %3762  ;;  %v2728_v18 = vmul.f32 %v3241_v6, %v2718_v30 }
0x1708   :  { %v2719_v14 = vmul.f32 %v3763_v12, %v2687_v48  ;;  %v2737_v17 = vadd.f32 %v3242_v11, %v2727_v60 }
0x1709   :  { %v2738_v21 = vadd.f32 %v3242_v11, %v2728_v18 }
0x170a   :  { %v2740_v19 = vpack.c.bf16 %v2737_v17, %v2736_v15  ;;  %v2729_v20 = vmul.f32 %v3241_v6, %v2719_v14 }
0x170c   :  { %3579 = vmatprep.mubr.msk.bf16.mxu1 %vm234_vm6, %v2740_v19  ;;  %v2739_v22 = vadd.f32 %v3242_v11, %v2729_v20 }
0x170e   :  { %v2741_v24 = vpack.c.bf16 %v2739_v22, %v2738_v21 }
0x1710   :  { %3580 = vmatmul.mubr.msk.bf16.vlgmr.msra.gmra.mxu1 %vm234_vm6, %v2741_v24 }
0x17d0   :  { %v3581_v2 = vpop.f32.mrf.mxu1 }
0x17d1   :  { %v2811_v38 = vmul.f32 %v3581_v2, %v3581_v2 }
0x17d2   :  { %v2794_v40 = vpop.f32.mrf.mxu1 }
0x17d3   :  { %v2815_v3 = vmul.f32 %v3581_v2, %v2811_v38  ;;  %v2809_v63 = vmul.f32 %v2794_v40, %v2794_v40 }
0x17d4   :  { %v3582_v8 = vpop.f32.mrf.mxu1 }
0x17d5   :  { %v2819_v43 = vmul.f32 0.044715, %v2815_v3  ;;  %v2813_v27 = vmul.f32 %v2809_v63, %v2794_v40  ;;  %v2812_v45 = vmul.f32 %v3582_v8, %v3582_v8 }
0x17d6   :  { %v2797_v46 = vpop.f32.mrf.mxu1 }
0x17d7   :  { %v2823_v47 = vadd.f32 %v3581_v2, %v2819_v43  ;;  %v2817_v13 = vmul.f32 0.044715, %v2813_v27  ;;  %v2816_v5 = vmul.f32 %v3582_v8, %v2812_v45  ;;  %v2810_v48 = vmul.f32 %v2797_v46, %v2797_v46 }
0x17d9   :  { %v2827_v16 = vmul.f32 0.7978846, %v2823_v47  ;;  %v2821_v49 = vadd.f32 %v2817_v13, %v2794_v40  ;;  %v2820_v50 = vmul.f32 0.044715, %v2816_v5  ;;  %v2814_v51 = vmul.f32 %v2810_v48, %v2797_v46  ;;  %v3658_v47 = vld [vmem:[%s4482_s13 + $0x8] sm:$0xff]   ;;  %v3659_v13 = vld [vmem:[%s4482_s13] sm:$0xff]  }
0x17da   :  { %3603 = vmatprep.subr.bf16.mxu1 %v3658_v47 }
0x17db   :  { %v2825_v52 = vmul.f32 0.7978846, %v2821_v49  ;;  %v2824_v53 = vadd.f32 %v3582_v8, %v2820_v50  ;;  %v2818_v54 = vmul.f32 0.044715, %v2814_v51  ;;  %3764 = vtanh.f32 %v2827_v16  ;;  %3604 = vmatpush3.bf16.msra.mxu1 %v3658_v47 }
0x17dc   :  { %3605 = vmatprep.subr.bf16.mxu1 %v3659_v13 }
0x17dd   :  { %3766 = vtanh.f32 %v2825_v52  ;;  %v2828_v61 = vmul.f32 0.7978846, %v2824_v53  ;;  %v2822_v55 = vadd.f32 %v2818_v54, %v2797_v46 }
0x17df   :  { %3768 = vtanh.f32 %v2828_v61  ;;  %v2826_v56 = vmul.f32 0.7978846, %v2822_v55  ;;  %3606 = vmatpush3.bf16.msra.mxu1 %v3659_v13 }
0x17e1   :  { %3770 = vtanh.f32 %v2826_v56 }
0x17e8   :  { %v3765_v58 = vpop.eup %3764 }
0x17e9   :  { %v2835_v23 = vadd.f32 1.0, %v3765_v58 }
0x17ea   :  { %v3767_v62 = vpop.eup %3766 }
0x17eb   :  { %v2833_v28 = vadd.f32 1.0, %v3767_v62  ;;  %v2839_v6 = vmul.f32 0.5, %v2835_v23  ;;  %v3255_v62 = vld [vmem:[%s4483_s11] ss:$0 sm:$0xff] }
0x17ec   :  { %v3769_v1 = vpop.eup %3768 }
0x17ed   :  { %v2836_v25 = vadd.f32 1.0, %v3769_v1  ;;  %v2837_v42 = vmul.f32 0.5, %v2833_v28  ;;  %v2843_v30 = vmul.f32 %v3581_v2, %v2839_v6  ;;  %v3256_v1 = vld [vmem:[%s4484_s12] ss:$0 sm:$0xff] }
0x17ee   :  { %v3771_v4 = vpop.eup %3770 }
0x17ef   :  { %v2840_v7 = vmul.f32 0.5, %v2836_v25  ;;  %v2834_v9 = vadd.f32 1.0, %v3771_v4  ;;  %v2841_v39 = vmul.f32 %v2837_v42, %v2794_v40 }
0x17f1   :  { %v2838_v29 = vmul.f32 0.5, %v2834_v9  ;;  %v2844_v32 = vmul.f32 %v3582_v8, %v2840_v7 }
0x17f3   :  { %v2842_v10 = vmul.f32 %v2838_v29, %v2797_v46  ;;  %v2846_v60 = vpack.c.bf16 %v2844_v32, %v2843_v30 }
0x17f5   :  { %v2845_v11 = vpack.c.bf16 %v2842_v10, %v2841_v39 }
0x17f7   :  { %3599 = vmatprep.mubr.bf16.mxu0 %v2845_v11 }
0x17f8   :  { %3600 = vmatmul.mubr.bf16.vlgmr.msra.gmra.mxu0 %v2846_v60 }
0x18b8   :  { %v3601_v12 = vpop.f32.mrf.mxu0 }
0x18b9   :  { %v2946_v18 = vadd.f32 %v3601_v12, %v4355_v31 }
0x18ba   :  { %v2929_v14 = vpop.f32.mrf.mxu0 }
0x18bb   :  { %v2944_v15 = vadd.f32 %v2929_v14, %v4352_v26  ;;  %v2956_v24 = vsel %vm234_vm6, %v2946_v18, 0.0 }
0x18bc   :  { %v3602_v17 = vpop.f32.mrf.mxu0 }
0x18bd   :  { %v2950_v19 = vsel %vm234_vm6, %v2944_v15, 0.0  ;;  %v2947_v22 = vadd.f32 %v3602_v17, %v4363_v35 }
0x18be   :  { %2951 = vadd.xlane.f32.xlu1 %v2950_v19  ;;  %v2932_v20 = vpop.f32.mrf.mxu0 }
0x18bf   :  { %v2945_v21 = vadd.f32 %v2932_v20, %v4360_v44  ;;  %v2959_v34 = vsel %vm234_vm6, %v2947_v22, 0.0 }
0x18c1   :  { %v2953_v33 = vsel %vm234_vm6, %v2945_v21, 0.0 }
0x18c2   :  { %2957 = vadd.xlane.f32.xlu1 %v2956_v24  ;;  %2954 = vadd.xlane.f32.xlu0 %v2953_v33 }
0x18c6   :  { %2960 = vadd.xlane.f32.xlu0 %v2959_v34 }
0x1947   :  { %v2952_v26 = vpop.xlane.xlu1 %2951 }
0x1948   :  { %v2962_v41 = vmul.f32 0.03125, %v2952_v26 }
0x194a   :  { %v2966_v31 = vsub.f32 %v2944_v15, %v2962_v41 }
0x194b   :  { %v2958_v36 = vpop.xlane.xlu1 %2957  ;;  %v2955_v57 = vpop.xlane.xlu0 %2954 }
0x194c   :  { %v2964_v59 = vmul.f32 0.03125, %v2958_v36  ;;  %v2963_v37 = vmul.f32 0.03125, %v2955_v57  ;;  %v2970_v0 = vmul.f32 %v2966_v31, %v2966_v31 }
0x194e   :  { %v2968_v44 = vsub.f32 %v2946_v18, %v2964_v59  ;;  %v2967_v2 = vsub.f32 %v2945_v21, %v2963_v37  ;;  %v2974_v35 = vsel %vm234_vm6, %v2970_v0, 0.0 }
0x194f   :  { %2975 = vadd.xlane.f32.xlu1 %v2974_v35  ;;  %v2961_v38 = vpop.xlane.xlu0 %2960 }
0x1950   :  { %v2965_v40 = vmul.f32 0.03125, %v2961_v38  ;;  %v2972_v3 = vmul.f32 %v2968_v44, %v2968_v44  ;;  %v2971_v63 = vmul.f32 %v2967_v2, %v2967_v2 }
0x1952   :  { %v2969_v8 = vsub.f32 %v2947_v22, %v2965_v40  ;;  %v2980_v43 = vsel %vm234_vm6, %v2972_v3, 0.0  ;;  %v2977_v27 = vsel %vm234_vm6, %v2971_v63, 0.0 }
0x1953   :  { %2981 = vadd.xlane.f32.xlu1 %v2980_v43  ;;  %2978 = vadd.xlane.f32.xlu0 %v2977_v27 }
0x1954   :  { %v2973_v45 = vmul.f32 %v2969_v8, %v2969_v8 }
0x1956   :  { %v2983_v46 = vsel %vm234_vm6, %v2973_v45, 0.0 }
0x1957   :  { %2984 = vadd.xlane.f32.xlu0 %v2983_v46 }
0x19d8   :  { %v2976_v5 = vpop.xlane.xlu1 %2975 }
0x19d9   :  { %v2986_v48 = vmul.f32 0.03125, %v2976_v5 }
0x19db   :  { %v2990_v16 = vadd.f32 1e-05, %v2986_v48 }
0x19dc   :  { %v2982_v49 = vpop.xlane.xlu1 %2981  ;;  %v2979_v50 = vpop.xlane.xlu0 %2978 }
0x19dd   :  { %3772 = vrsqrt.f32 %v2990_v16  ;;  %v2988_v51 = vmul.f32 0.03125, %v2982_v49  ;;  %v2987_v52 = vmul.f32 0.03125, %v2979_v50 }
0x19df   :  { %v2992_v53 = vadd.f32 1e-05, %v2988_v51  ;;  %v2991_v54 = vadd.f32 1e-05, %v2987_v52 }
0x19e0   :  { %v2985_v61 = vpop.xlane.xlu0 %2984 }
0x19e1   :  { %3774 = vrsqrt.f32 %v2992_v53  ;;  %v2989_v55 = vmul.f32 0.03125, %v2985_v61 }
0x19e2   :  { %3776 = vrsqrt.f32 %v2991_v54 }
0x19e3   :  { %v2993_v56 = vadd.f32 1e-05, %v2989_v55 }
0x19e5   :  { %3778 = vrsqrt.f32 %v2993_v56 }
0x19ea   :  { %v3773_v58 = vpop.eup %3772 }
0x19eb   :  { %v2998_v28 = vmul.f32 %v3773_v58, %v2966_v31 }
0x19ed   :  { %v3008_v23 = vmul.f32 %v3255_v62, %v2998_v28 }
0x19ee   :  { %v3775_v25 = vpop.eup %3774 }
0x19ef   :  { %v3777_v4 = vpop.eup %3776  ;;  %v3000_v42 = vmul.f32 %v3775_v25, %v2968_v44  ;;  %v3018_v7 = vadd.f32 %v3256_v1, %v3008_v23 }
0x19f0   :  { %v2999_v9 = vmul.f32 %v3777_v4, %v2967_v2 }
0x19f1   :  { %3022 = vst.msk [vmem:[%s4485_s14] sm:$0xff] %vm234_vm6, %v3018_v7  ;;  %v3010_v6 = vmul.f32 %v3255_v62, %v3000_v42 }
0x19f2   :  { %v3779_v29 = vpop.eup %3778  ;;  %v3009_v32 = vmul.f32 %v3255_v62, %v2999_v9 }
0x19f3   :  { %v3001_v39 = vmul.f32 %v3779_v29, %v2969_v8  ;;  %v3020_v10 = vadd.f32 %v3256_v1, %v3010_v6 }
0x19f4   :  { %v3019_v30 = vadd.f32 %v3256_v1, %v3009_v32 }
0x19f5   :  { %v3011_v11 = vmul.f32 %v3255_v62, %v3001_v39  ;;  %3024 = vst.msk [vmem:[%s4485_s14 + $0x10] sm:$0xff] %vm234_vm6, %v3020_v10 }
0x19f6   :  { %3023 = vst.msk [vmem:[%s4485_s14 + $0x8] sm:$0xff] %vm234_vm6, %v3019_v30  ;;  %v3026_v60 = vpack.c.bf16 %v3019_v30, %v3018_v7 }
0x19f7   :  { %v3021_v12 = vadd.f32 %v3256_v1, %v3011_v11 }
0x19f8   :  { %3607 = vmatprep.mubr.msk.bf16.mxu1 %vm234_vm6, %v3026_v60 }
0x19f9   :  { %3025 = vst.msk [vmem:[%s4485_s14 + $0x18] sm:$0xff] %vm234_vm6, %v3021_v12  ;;  %v3027_v14 = vpack.c.bf16 %v3021_v12, %v3020_v10 }
0x19fb   :  { %3608 = vmatmul.mubr.msk.bf16.vlgmr.msra.gmra.mxu1 %vm234_vm6, %v3027_v14 }
0x1abb   :  { %v3609_v15 = vpop.f32.mrf.mxu1 }
0x1abc   :  { %3101 = vst [vmem:[%s4486_s15 + $0x10] sm:$0xff] %v3609_v15 }
0x1abd   :  { %v3084_v17 = vpop.f32.mrf.mxu1 }
0x1abe   :  { %3099 = vst [vmem:[%s4486_s15] sm:$0xff] %v3084_v17 }
0x1abf   :  { %v3610_v18 = vpop.f32.mrf.mxu1 }
0x1ac0   :  { %3102 = vst [vmem:[%s4486_s15 + $0x18] sm:$0xff] %v3610_v18 }
0x1ac1   :  { %v3087_v19 = vpop.f32.mrf.mxu1 }
0x1ac2   :  { %3100 = vst [vmem:[%s4486_s15 + $0x8] sm:$0xff] %v3087_v19 }

</bundles_post_ra>
